<compile_context>
chip_gen: v5e
topology: v5e:2x2
jax: 0.10.0
libtpu: 0.0.40
codegen_flags: <defaults>
</compile_context>

<pallas_src>
import functools

import jax
import jax.numpy as jnp
from jax.experimental import pallas as pl
from jax.experimental.pallas import tpu as pltpu

PAD = 128          # lane-dense feature width (all true feature dims <= 128)
BN_EPS = 1e-5

# ReLU pattern of the 9 BN stages: enc1..3 ReLU, z1..z3 no ReLU, dec1..3 ReLU.
_RELU = (True, True, True, False, False, False, True, True, True)


# ---------------------------------------------------------------------------
# Fused kernel: entire AE forward in one body (no grid, everything resident).
# ---------------------------------------------------------------------------
def _ae_fused_kernel(x_ref, w_ref, g_ref, be_ref, b_ref,
                     xbar_ref, e1_ref, e2_ref, e3_ref,
                     z3_ref, z2_ref, z1_ref, d3_ref, *, n_in):
    # x_ref  : (B, n_in)        f32 input at its true width
    # w_ref  : (10, PAD, PAD)   bf16, pre-transposed + zero-padded (use x @ W)
    # g_ref  : (9, PAD)  f32    BN gammas (padded lanes -> 0)
    # be_ref : (9, PAD)  f32    BN betas  (padded lanes -> 0)
    # b_ref  : (1, PAD)  f32    bias of the final x_bar Linear (padded -> 0)
    # out refs: 8 x (B, PAD)    lane-dense f32 outputs
    stage_out = {0: e1_ref, 1: e2_ref, 2: e3_ref, 3: z1_ref, 4: z2_ref,
                 5: z3_ref, 8: d3_ref}

    h = x_ref[...]                                      # f32
    for i in range(9):
        # Linear (bias dropped: cancelled by the BN batch-mean subtraction).
        lhs = h.astype(jnp.bfloat16)
        rhs = w_ref[0, :n_in, :] if i == 0 else w_ref[i]
        pre = jnp.dot(lhs, rhs, preferred_element_type=jnp.float32)

        # BatchNorm1d, training mode: batch mean / biased batch variance.
        mean = jnp.mean(pre, axis=0, keepdims=True)
        c = pre - mean
        var = jnp.mean(c * c, axis=0, keepdims=True)
        # scale/shift math on the (1,PAD) row; 2-op apply on the big array.
        scale = g_ref[i:i + 1, :] * jax.lax.rsqrt(var + BN_EPS)
        h = c * scale + be_ref[i:i + 1, :]
        if _RELU[i]:
            h = jnp.maximum(h, 0.0)

        # Eager store: free the live range, let vst overlap the next layer.
        if i in stage_out:
            stage_out[i][...] = h

    # Final plain Linear (no BN / ReLU), bias kept.
    xbar_ref[...] = jnp.dot(h.astype(jnp.bfloat16), w_ref[9],
                            preferred_element_type=jnp.float32) + b_ref[...]


def ae_forward(packed, x):
    """Fused AE forward. Returns 8 lane-padded (B, PAD) f32 outputs in module
    order (x_bar, enc_h1, enc_h2, enc_h3, z3, z2, z1, dec_h3); consumers slice
    the true widths lazily."""
    w_stack, g_stack, be_stack, b_last = packed
    batch, n_in = x.shape
    x = x.astype(jnp.float32)
    if n_in % 16 != 0:
        # keep the first-layer weight slice sublane-aligned for bf16 packing
        pad_to = ((n_in + 15) // 16) * 16
        x = jnp.pad(x, ((0, 0), (0, pad_to - n_in)))
        n_in = pad_to

    vmem = pl.BlockSpec(memory_space=pltpu.MemorySpace.VMEM)
    kernel = functools.partial(_ae_fused_kernel, n_in=n_in)
    return pl.pallas_call(
        kernel,
        out_shape=tuple(jax.ShapeDtypeStruct((batch, PAD), jnp.float32)
                        for _ in range(8)),
        in_specs=[vmem] * 5,
        out_specs=tuple([vmem] * 8),
        # No-grid, everything-resident design: ~5 KiB VMEM per batch row for
        # in/out/temps + 320 KiB bf16 weights.  32 MiB keeps us safely inside
        # the v7x scoped limit; batches in the thousands need the batch-grid
        # + two-pass-BN variant (see TODO above).
        compiler_params=pltpu.CompilerParams(
            vmem_limit_bytes=32 * 1024 * 1024),
    )(x, w_stack, g_stack, be_stack, b_last)


# ---------------------------------------------------------------------------
# Parameters: PyTorch-style init, then one-time packing (transpose+pad+bf16).
# ---------------------------------------------------------------------------
def init_linear(key, n_in, n_out):
    kw, kb = jax.random.split(key)
    bound = 1.0 / jnp.sqrt(jnp.float32(n_in))
    w = jax.random.uniform(kw, (n_out, n_in), jnp.float32, -bound, bound)
    b = jax.random.uniform(kb, (n_out,), jnp.float32, -bound, bound)
    return w, b


def make_ae_params(key, dims):
    (n_input, n_enc_1, n_enc_2, n_enc_3,
     n_z1, n_z2, n_z3, n_dec_1, n_dec_2, n_dec_3) = dims
    layer_dims = [
        (n_input, n_enc_1), (n_enc_1, n_enc_2), (n_enc_2, n_enc_3),
        (n_enc_3, n_z1), (n_z1, n_z2), (n_z2, n_z3),
        (n_z3, n_dec_1), (n_dec_1, n_dec_2), (n_dec_2, n_dec_3),
        (n_dec_3, n_input),
    ]
    keys = jax.random.split(key, len(layer_dims))
    params = []
    for k, (din, dout) in zip(keys, layer_dims):
        w, b = init_linear(k, din, dout)
        g = jnp.ones((dout,), jnp.float32)       # BatchNorm1d default weight
        beta = jnp.zeros((dout,), jnp.float32)   # BatchNorm1d default bias
        params.append((w, b, g, beta))
    return params


def pack_params(params):
    """One-time packing (outside jit): transpose, zero-pad, cast weights bf16."""
    assert len(params) == 10
    w_list, g_list, be_list = [], [], []
    for i, (w, b, g, beta) in enumerate(params):
        dout, din = w.shape
        assert din <= PAD and dout <= PAD
        wt = jnp.zeros((PAD, PAD), jnp.float32).at[:din, :dout].set(w.T)
        w_list.append(wt.astype(jnp.bfloat16))
        if i < 9:   # BN layers: keep gamma/beta, drop the (cancelled) bias
            g_list.append(jnp.zeros((PAD,), jnp.float32).at[:dout].set(g))
            be_list.append(jnp.zeros((PAD,), jnp.float32).at[:dout].set(beta))
    w_last, b_last_raw = params[9][0], params[9][1]
    b_last = jnp.zeros((1, PAD), jnp.float32).at[0, :w_last.shape[0]].set(
        b_last_raw)
    return (jnp.stack(w_list), jnp.stack(g_list), jnp.stack(be_list), b_last)


# ---------------------------------------------------------------------------
# Pure-JAX references (full module fidelity, incl. BN-layer biases).
# `matmul_dtype=bf16` mirrors the kernel's mixed-precision matmul policy.
# ---------------------------------------------------------------------------
def ae_forward_ref(params, x, matmul_dtype=jnp.float32):
    def mm(h, w):
        return jnp.dot(h.astype(matmul_dtype), w.T.astype(matmul_dtype),
                       preferred_element_type=jnp.float32)

    def stage(h, p, relu):
        w, b, g, beta = p
        pre = mm(h, w) + b
        mean = pre.mean(0, keepdims=True)
        c = pre - mean
        var = (c * c).mean(0, keepdims=True)
        out = c * (g * jax.lax.rsqrt(var + BN_EPS)) + beta
        return jnp.maximum(out, 0.0) if relu else out

    e1 = stage(x, params[0], True)
    e2 = stage(e1, params[1], True)
    e3 = stage(e2, params[2], True)
    z1 = stage(e3, params[3], False)
    z2 = stage(z1, params[4], False)
    z3 = stage(z2, params[5], False)
    d1 = stage(z3, params[6], True)
    d2 = stage(d1, params[7], True)
    d3 = stage(d2, params[8], True)
    w, b = params[9][0], params[9][1]
    x_bar = mm(d3, w) + b
    return (x_bar, e1, e2, e3, z3, z2, z1, d3)


if __name__ == "__main__":
    batch = 8
    n_input = 32
    dims = (n_input, 64, 48, 32,   # n_input, n_enc_1, n_enc_2, n_enc_3
            24, 16, 8,             # n_z1, n_z2, n_z3
            32, 48, 64)            # n_dec_1, n_dec_2, n_dec_3
    (_, n_enc_1, n_enc_2, n_enc_3,
     n_z1, n_z2, n_z3, n_dec_1, n_dec_2, n_dec_3) = dims
    out_dims = (n_input, n_enc_1, n_enc_2, n_enc_3, n_z3, n_z2, n_z1, n_dec_3)
    names = ("x_bar", "enc_h1", "enc_h2", "enc_h3", "z3", "z2", "z1", "dec_h3")

    key = jax.random.PRNGKey(0)
    k_param, k_x = jax.random.split(key)
    params = make_ae_params(k_param, dims)
    packed = pack_params(params)
    x = jax.random.normal(k_x, (batch, n_input), jnp.float32)

    fwd = jax.jit(ae_forward)
    outs_pad = jax.block_until_ready(fwd(packed, x))

    # Consumer-side lazy slicing of the lane-padded outputs.
    outs = tuple(o[:, :d] for o, d in zip(outs_pad, out_dims))

    # Shape / finiteness / padding-invariant checks.
    expected = {n: (batch, d) for n, d in zip(names, out_dims)}
    got = {n: o.shape for n, o in zip(names, outs)}
    assert got == expected, (got, expected)
    assert all(bool(jnp.all(jnp.isfinite(o))) for o in outs)
    for o, d in zip(outs_pad, out_dims):
        assert bool(jnp.all(o[:, d:] == 0.0))   # padded lanes stay exactly 0

    # (1) Tight check vs. a reference that uses the same bf16-matmul policy.
    refs_bf16 = ae_forward_ref(params, x, matmul_dtype=jnp.bfloat16)
    for n, o, r in zip(names, outs, refs_bf16):
        assert jnp.allclose(o, r, rtol=1e-2, atol=1e-2), (
            n, float(jnp.max(jnp.abs(o - r))))

    # (2) Sanity check vs. the exact f32 PyTorch-semantics reference
    #     (bounds the bf16 mixed-precision error of the matmuls).
    refs_f32 = ae_forward_ref(params, x, matmul_dtype=jnp.float32)
    for n, o, r in zip(names, outs, refs_f32):
        rel = float(jnp.linalg.norm(o - r) / (jnp.linalg.norm(r) + 1e-6))
        assert rel < 0.15, (n, rel)

    print("KERNEL_OK")
</pallas_src>

<mosaic_0001>
module attributes {stable_mosaic.version = 11 : i64} {
  func.func @_ae_fused_kernel(%arg0: memref<8x32xf32, #tpu.memory_space<vmem>>, %arg1: memref<10x128x128xbf16, #tpu.memory_space<vmem>>, %arg2: memref<9x128xf32, #tpu.memory_space<vmem>>, %arg3: memref<9x128xf32, #tpu.memory_space<vmem>>, %arg4: memref<1x128xf32, #tpu.memory_space<vmem>>, %arg5: memref<8x128xf32, #tpu.memory_space<vmem>>, %arg6: memref<8x128xf32, #tpu.memory_space<vmem>>, %arg7: memref<8x128xf32, #tpu.memory_space<vmem>>, %arg8: memref<8x128xf32, #tpu.memory_space<vmem>>, %arg9: memref<8x128xf32, #tpu.memory_space<vmem>>, %arg10: memref<8x128xf32, #tpu.memory_space<vmem>>, %arg11: memref<8x128xf32, #tpu.memory_space<vmem>>, %arg12: memref<8x128xf32, #tpu.memory_space<vmem>>) attributes {dimension_semantics = [], scalar_prefetch = 0 : i64, scratch_operands = 0 : i64, tpu.core_type = #tpu.core_type<tc>} {
    %c0 = arith.constant 0 : index
    %c0_0 = arith.constant 0 : index
    %0 = vector.load %arg0[%c0, %c0_0] : memref<8x32xf32, #tpu.memory_space<vmem>>, vector<8x32xf32>
    %1 = arith.truncf %0 : vector<8x32xf32> to vector<8x32xbf16>
    %c0_1 = arith.constant 0 : index
    %c0_2 = arith.constant 0 : index
    %c0_3 = arith.constant 0 : index
    %2 = vector.load %arg1[%c0_1, %c0_2, %c0_3] : memref<10x128x128xbf16, #tpu.memory_space<vmem>>, vector<1x32x128xbf16>
    %3 = vector.shape_cast %2 : vector<1x32x128xbf16> to vector<32x128xbf16>
    %cst = arith.constant dense<0.000000e+00> : vector<8x128xf32>
    %4 = tpu.matmul %1, %3, %cst {dimension_numbers = #tpu.dot_dimension_numbers<[1], [0], [0], [1], [0, 0, 1, 1], [], []>} : vector<8x32xbf16>, vector<32x128xbf16>, vector<8x128xf32> -> vector<8x128xf32>
    %cst_4 = arith.constant dense<0.000000e+00> : vector<128xf32>
    %5 = vector.multi_reduction <add>, %4, %cst_4 [0] : vector<8x128xf32> to vector<128xf32>
    %6 = vector.shape_cast %5 : vector<128xf32> to vector<1x128xf32>
    %cst_5 = arith.constant 8.000000e+00 : f32
    %7 = vector.broadcast %cst_5 : f32 to vector<1x128xf32>
    %8 = arith.divf %6, %7 : vector<1x128xf32>
    %9 = vector.broadcast %8 : vector<1x128xf32> to vector<8x128xf32>
    %10 = arith.subf %4, %9 : vector<8x128xf32>
    %11 = arith.mulf %10, %10 : vector<8x128xf32>
    %cst_6 = arith.constant dense<0.000000e+00> : vector<128xf32>
    %12 = vector.multi_reduction <add>, %11, %cst_6 [0] : vector<8x128xf32> to vector<128xf32>
    %13 = vector.shape_cast %12 : vector<128xf32> to vector<1x128xf32>
    %cst_7 = arith.constant 8.000000e+00 : f32
    %14 = vector.broadcast %cst_7 : f32 to vector<1x128xf32>
    %15 = arith.divf %13, %14 : vector<1x128xf32>
    %c0_8 = arith.constant 0 : index
    %c0_9 = arith.constant 0 : index
    %16 = vector.load %arg2[%c0_8, %c0_9] : memref<9x128xf32, #tpu.memory_space<vmem>>, vector<1x128xf32>
    %cst_10 = arith.constant 9.99999974E-6 : f32
    %17 = vector.broadcast %cst_10 : f32 to vector<1x128xf32>
    %18 = arith.addf %15, %17 : vector<1x128xf32>
    %19 = math.rsqrt %18 : vector<1x128xf32>
    %20 = arith.mulf %16, %19 : vector<1x128xf32>
    %21 = vector.broadcast %20 : vector<1x128xf32> to vector<8x128xf32>
    %22 = arith.mulf %10, %21 : vector<8x128xf32>
    %c0_11 = arith.constant 0 : index
    %c0_12 = arith.constant 0 : index
    %23 = vector.load %arg3[%c0_11, %c0_12] : memref<9x128xf32, #tpu.memory_space<vmem>>, vector<1x128xf32>
    %24 = vector.broadcast %23 : vector<1x128xf32> to vector<8x128xf32>
    %25 = arith.addf %22, %24 : vector<8x128xf32>
    %cst_13 = arith.constant 0.000000e+00 : f32
    %26 = vector.broadcast %cst_13 : f32 to vector<8x128xf32>
    %27 = arith.maximumf %25, %26 : vector<8x128xf32>
    %c0_14 = arith.constant 0 : index
    %c0_15 = arith.constant 0 : index
    %28 = vector.load %arg6[%c0_14, %c0_15] : memref<8x128xf32, #tpu.memory_space<vmem>>, vector<8x128xf32>
    tpu.vector_store %arg6[%c0_14, %c0_15], %27 {strides = array<i32>} : memref<8x128xf32, #tpu.memory_space<vmem>>, vector<8x128xf32>,
    %29 = arith.truncf %27 : vector<8x128xf32> to vector<8x128xbf16>
    %c1 = arith.constant 1 : index
    %c0_16 = arith.constant 0 : index
    %c0_17 = arith.constant 0 : index
    %30 = vector.load %arg1[%c1, %c0_16, %c0_17] : memref<10x128x128xbf16, #tpu.memory_space<vmem>>, vector<1x128x128xbf16>
    %31 = vector.shape_cast %30 : vector<1x128x128xbf16> to vector<128x128xbf16>
    %cst_18 = arith.constant dense<0.000000e+00> : vector<8x128xf32>
    %32 = tpu.matmul %29, %31, %cst_18 {dimension_numbers = #tpu.dot_dimension_numbers<[1], [0], [0], [1], [0, 0, 1, 1], [], []>} : vector<8x128xbf16>, vector<128x128xbf16>, vector<8x128xf32> -> vector<8x128xf32>
    %cst_19 = arith.constant dense<0.000000e+00> : vector<128xf32>
    %33 = vector.multi_reduction <add>, %32, %cst_19 [0] : vector<8x128xf32> to vector<128xf32>
    %34 = vector.shape_cast %33 : vector<128xf32> to vector<1x128xf32>
    %cst_20 = arith.constant 8.000000e+00 : f32
    %35 = vector.broadcast %cst_20 : f32 to vector<1x128xf32>
    %36 = arith.divf %34, %35 : vector<1x128xf32>
    %37 = vector.broadcast %36 : vector<1x128xf32> to vector<8x128xf32>
    %38 = arith.subf %32, %37 : vector<8x128xf32>
    %39 = arith.mulf %38, %38 : vector<8x128xf32>
    %cst_21 = arith.constant dense<0.000000e+00> : vector<128xf32>
    %40 = vector.multi_reduction <add>, %39, %cst_21 [0] : vector<8x128xf32> to vector<128xf32>
    %41 = vector.shape_cast %40 : vector<128xf32> to vector<1x128xf32>
    %cst_22 = arith.constant 8.000000e+00 : f32
    %42 = vector.broadcast %cst_22 : f32 to vector<1x128xf32>
    %43 = arith.divf %41, %42 : vector<1x128xf32>
    %c1_23 = arith.constant 1 : index
    %c0_24 = arith.constant 0 : index
    %44 = vector.load %arg2[%c1_23, %c0_24] : memref<9x128xf32, #tpu.memory_space<vmem>>, vector<1x128xf32>
    %cst_25 = arith.constant 9.99999974E-6 : f32
    %45 = vector.broadcast %cst_25 : f32 to vector<1x128xf32>
    %46 = arith.addf %43, %45 : vector<1x128xf32>
    %47 = math.rsqrt %46 : vector<1x128xf32>
    %48 = arith.mulf %44, %47 : vector<1x128xf32>
    %49 = vector.broadcast %48 : vector<1x128xf32> to vector<8x128xf32>
    %50 = arith.mulf %38, %49 : vector<8x128xf32>
    %c1_26 = arith.constant 1 : index
    %c0_27 = arith.constant 0 : index
    %51 = vector.load %arg3[%c1_26, %c0_27] : memref<9x128xf32, #tpu.memory_space<vmem>>, vector<1x128xf32>
    %52 = vector.broadcast %51 : vector<1x128xf32> to vector<8x128xf32>
    %53 = arith.addf %50, %52 : vector<8x128xf32>
    %cst_28 = arith.constant 0.000000e+00 : f32
    %54 = vector.broadcast %cst_28 : f32 to vector<8x128xf32>
    %55 = arith.maximumf %53, %54 : vector<8x128xf32>
    %c0_29 = arith.constant 0 : index
    %c0_30 = arith.constant 0 : index
    %56 = vector.load %arg7[%c0_29, %c0_30] : memref<8x128xf32, #tpu.memory_space<vmem>>, vector<8x128xf32>
    tpu.vector_store %arg7[%c0_29, %c0_30], %55 {strides = array<i32>} : memref<8x128xf32, #tpu.memory_space<vmem>>, vector<8x128xf32>,
    %57 = arith.truncf %55 : vector<8x128xf32> to vector<8x128xbf16>
    %c2 = arith.constant 2 : index
    %c0_31 = arith.constant 0 : index
    %c0_32 = arith.constant 0 : index
    %58 = vector.load %arg1[%c2, %c0_31, %c0_32] : memref<10x128x128xbf16, #tpu.memory_space<vmem>>, vector<1x128x128xbf16>
    %59 = vector.shape_cast %58 : vector<1x128x128xbf16> to vector<128x128xbf16>
    %cst_33 = arith.constant dense<0.000000e+00> : vector<8x128xf32>
    %60 = tpu.matmul %57, %59, %cst_33 {dimension_numbers = #tpu.dot_dimension_numbers<[1], [0], [0], [1], [0, 0, 1, 1], [], []>} : vector<8x128xbf16>, vector<128x128xbf16>, vector<8x128xf32> -> vector<8x128xf32>
    %cst_34 = arith.constant dense<0.000000e+00> : vector<128xf32>
    %61 = vector.multi_reduction <add>, %60, %cst_34 [0] : vector<8x128xf32> to vector<128xf32>
    %62 = vector.shape_cast %61 : vector<128xf32> to vector<1x128xf32>
    %cst_35 = arith.constant 8.000000e+00 : f32
    %63 = vector.broadcast %cst_35 : f32 to vector<1x128xf32>
    %64 = arith.divf %62, %63 : vector<1x128xf32>
    %65 = vector.broadcast %64 : vector<1x128xf32> to vector<8x128xf32>
    %66 = arith.subf %60, %65 : vector<8x128xf32>
    %67 = arith.mulf %66, %66 : vector<8x128xf32>
    %cst_36 = arith.constant dense<0.000000e+00> : vector<128xf32>
    %68 = vector.multi_reduction <add>, %67, %cst_36 [0] : vector<8x128xf32> to vector<128xf32>
    %69 = vector.shape_cast %68 : vector<128xf32> to vector<1x128xf32>
    %cst_37 = arith.constant 8.000000e+00 : f32
    %70 = vector.broadcast %cst_37 : f32 to vector<1x128xf32>
    %71 = arith.divf %69, %70 : vector<1x128xf32>
    %c2_38 = arith.constant 2 : index
    %c0_39 = arith.constant 0 : index
    %72 = vector.load %arg2[%c2_38, %c0_39] : memref<9x128xf32, #tpu.memory_space<vmem>>, vector<1x128xf32>
    %cst_40 = arith.constant 9.99999974E-6 : f32
    %73 = vector.broadcast %cst_40 : f32 to vector<1x128xf32>
    %74 = arith.addf %71, %73 : vector<1x128xf32>
    %75 = math.rsqrt %74 : vector<1x128xf32>
    %76 = arith.mulf %72, %75 : vector<1x128xf32>
    %77 = vector.broadcast %76 : vector<1x128xf32> to vector<8x128xf32>
    %78 = arith.mulf %66, %77 : vector<8x128xf32>
    %c2_41 = arith.constant 2 : index
    %c0_42 = arith.constant 0 : index
    %79 = vector.load %arg3[%c2_41, %c0_42] : memref<9x128xf32, #tpu.memory_space<vmem>>, vector<1x128xf32>
    %80 = vector.broadcast %79 : vector<1x128xf32> to vector<8x128xf32>
    %81 = arith.addf %78, %80 : vector<8x128xf32>
    %cst_43 = arith.constant 0.000000e+00 : f32
    %82 = vector.broadcast %cst_43 : f32 to vector<8x128xf32>
    %83 = arith.maximumf %81, %82 : vector<8x128xf32>
    %c0_44 = arith.constant 0 : index
    %c0_45 = arith.constant 0 : index
    %84 = vector.load %arg8[%c0_44, %c0_45] : memref<8x128xf32, #tpu.memory_space<vmem>>, vector<8x128xf32>
    tpu.vector_store %arg8[%c0_44, %c0_45], %83 {strides = array<i32>} : memref<8x128xf32, #tpu.memory_space<vmem>>, vector<8x128xf32>,
    %85 = arith.truncf %83 : vector<8x128xf32> to vector<8x128xbf16>
    %c3 = arith.constant 3 : index
    %c0_46 = arith.constant 0 : index
    %c0_47 = arith.constant 0 : index
    %86 = vector.load %arg1[%c3, %c0_46, %c0_47] : memref<10x128x128xbf16, #tpu.memory_space<vmem>>, vector<1x128x128xbf16>
    %87 = vector.shape_cast %86 : vector<1x128x128xbf16> to vector<128x128xbf16>
    %cst_48 = arith.constant dense<0.000000e+00> : vector<8x128xf32>
    %88 = tpu.matmul %85, %87, %cst_48 {dimension_numbers = #tpu.dot_dimension_numbers<[1], [0], [0], [1], [0, 0, 1, 1], [], []>} : vector<8x128xbf16>, vector<128x128xbf16>, vector<8x128xf32> -> vector<8x128xf32>
    %cst_49 = arith.constant dense<0.000000e+00> : vector<128xf32>
    %89 = vector.multi_reduction <add>, %88, %cst_49 [0] : vector<8x128xf32> to vector<128xf32>
    %90 = vector.shape_cast %89 : vector<128xf32> to vector<1x128xf32>
    %cst_50 = arith.constant 8.000000e+00 : f32
    %91 = vector.broadcast %cst_50 : f32 to vector<1x128xf32>
    %92 = arith.divf %90, %91 : vector<1x128xf32>
    %93 = vector.broadcast %92 : vector<1x128xf32> to vector<8x128xf32>
    %94 = arith.subf %88, %93 : vector<8x128xf32>
    %95 = arith.mulf %94, %94 : vector<8x128xf32>
    %cst_51 = arith.constant dense<0.000000e+00> : vector<128xf32>
    %96 = vector.multi_reduction <add>, %95, %cst_51 [0] : vector<8x128xf32> to vector<128xf32>
    %97 = vector.shape_cast %96 : vector<128xf32> to vector<1x128xf32>
    %cst_52 = arith.constant 8.000000e+00 : f32
    %98 = vector.broadcast %cst_52 : f32 to vector<1x128xf32>
    %99 = arith.divf %97, %98 : vector<1x128xf32>
    %c3_53 = arith.constant 3 : index
    %c0_54 = arith.constant 0 : index
    %100 = vector.load %arg2[%c3_53, %c0_54] : memref<9x128xf32, #tpu.memory_space<vmem>>, vector<1x128xf32>
    %cst_55 = arith.constant 9.99999974E-6 : f32
    %101 = vector.broadcast %cst_55 : f32 to vector<1x128xf32>
    %102 = arith.addf %99, %101 : vector<1x128xf32>
    %103 = math.rsqrt %102 : vector<1x128xf32>
    %104 = arith.mulf %100, %103 : vector<1x128xf32>
    %105 = vector.broadcast %104 : vector<1x128xf32> to vector<8x128xf32>
    %106 = arith.mulf %94, %105 : vector<8x128xf32>
    %c3_56 = arith.constant 3 : index
    %c0_57 = arith.constant 0 : index
    %107 = vector.load %arg3[%c3_56, %c0_57] : memref<9x128xf32, #tpu.memory_space<vmem>>, vector<1x128xf32>
    %108 = vector.broadcast %107 : vector<1x128xf32> to vector<8x128xf32>
    %109 = arith.addf %106, %108 : vector<8x128xf32>
    %c0_58 = arith.constant 0 : index
    %c0_59 = arith.constant 0 : index
    %110 = vector.load %arg11[%c0_58, %c0_59] : memref<8x128xf32, #tpu.memory_space<vmem>>, vector<8x128xf32>
    tpu.vector_store %arg11[%c0_58, %c0_59], %109 {strides = array<i32>} : memref<8x128xf32, #tpu.memory_space<vmem>>, vector<8x128xf32>,
    %111 = arith.truncf %109 : vector<8x128xf32> to vector<8x128xbf16>
    %c4 = arith.constant 4 : index
    %c0_60 = arith.constant 0 : index
    %c0_61 = arith.constant 0 : index
    %112 = vector.load %arg1[%c4, %c0_60, %c0_61] : memref<10x128x128xbf16, #tpu.memory_space<vmem>>, vector<1x128x128xbf16>
    %113 = vector.shape_cast %112 : vector<1x128x128xbf16> to vector<128x128xbf16>
    %cst_62 = arith.constant dense<0.000000e+00> : vector<8x128xf32>
    %114 = tpu.matmul %111, %113, %cst_62 {dimension_numbers = #tpu.dot_dimension_numbers<[1], [0], [0], [1], [0, 0, 1, 1], [], []>} : vector<8x128xbf16>, vector<128x128xbf16>, vector<8x128xf32> -> vector<8x128xf32>
    %cst_63 = arith.constant dense<0.000000e+00> : vector<128xf32>
    %115 = vector.multi_reduction <add>, %114, %cst_63 [0] : vector<8x128xf32> to vector<128xf32>
    %116 = vector.shape_cast %115 : vector<128xf32> to vector<1x128xf32>
    %cst_64 = arith.constant 8.000000e+00 : f32
    %117 = vector.broadcast %cst_64 : f32 to vector<1x128xf32>
    %118 = arith.divf %116, %117 : vector<1x128xf32>
    %119 = vector.broadcast %118 : vector<1x128xf32> to vector<8x128xf32>
    %120 = arith.subf %114, %119 : vector<8x128xf32>
    %121 = arith.mulf %120, %120 : vector<8x128xf32>
    %cst_65 = arith.constant dense<0.000000e+00> : vector<128xf32>
    %122 = vector.multi_reduction <add>, %121, %cst_65 [0] : vector<8x128xf32> to vector<128xf32>
    %123 = vector.shape_cast %122 : vector<128xf32> to vector<1x128xf32>
    %cst_66 = arith.constant 8.000000e+00 : f32
    %124 = vector.broadcast %cst_66 : f32 to vector<1x128xf32>
    %125 = arith.divf %123, %124 : vector<1x128xf32>
    %c4_67 = arith.constant 4 : index
    %c0_68 = arith.constant 0 : index
    %126 = vector.load %arg2[%c4_67, %c0_68] : memref<9x128xf32, #tpu.memory_space<vmem>>, vector<1x128xf32>
    %cst_69 = arith.constant 9.99999974E-6 : f32
    %127 = vector.broadcast %cst_69 : f32 to vector<1x128xf32>
    %128 = arith.addf %125, %127 : vector<1x128xf32>
    %129 = math.rsqrt %128 : vector<1x128xf32>
    %130 = arith.mulf %126, %129 : vector<1x128xf32>
    %131 = vector.broadcast %130 : vector<1x128xf32> to vector<8x128xf32>
    %132 = arith.mulf %120, %131 : vector<8x128xf32>
    %c4_70 = arith.constant 4 : index
    %c0_71 = arith.constant 0 : index
    %133 = vector.load %arg3[%c4_70, %c0_71] : memref<9x128xf32, #tpu.memory_space<vmem>>, vector<1x128xf32>
    %134 = vector.broadcast %133 : vector<1x128xf32> to vector<8x128xf32>
    %135 = arith.addf %132, %134 : vector<8x128xf32>
    %c0_72 = arith.constant 0 : index
    %c0_73 = arith.constant 0 : index
    %136 = vector.load %arg10[%c0_72, %c0_73] : memref<8x128xf32, #tpu.memory_space<vmem>>, vector<8x128xf32>
    tpu.vector_store %arg10[%c0_72, %c0_73], %135 {strides = array<i32>} : memref<8x128xf32, #tpu.memory_space<vmem>>, vector<8x128xf32>,
    %137 = arith.truncf %135 : vector<8x128xf32> to vector<8x128xbf16>
    %c5 = arith.constant 5 : index
    %c0_74 = arith.constant 0 : index
    %c0_75 = arith.constant 0 : index
    %138 = vector.load %arg1[%c5, %c0_74, %c0_75] : memref<10x128x128xbf16, #tpu.memory_space<vmem>>, vector<1x128x128xbf16>
    %139 = vector.shape_cast %138 : vector<1x128x128xbf16> to vector<128x128xbf16>
    %cst_76 = arith.constant dense<0.000000e+00> : vector<8x128xf32>
    %140 = tpu.matmul %137, %139, %cst_76 {dimension_numbers = #tpu.dot_dimension_numbers<[1], [0], [0], [1], [0, 0, 1, 1], [], []>} : vector<8x128xbf16>, vector<128x128xbf16>, vector<8x128xf32> -> vector<8x128xf32>
    %cst_77 = arith.constant dense<0.000000e+00> : vector<128xf32>
    %141 = vector.multi_reduction <add>, %140, %cst_77 [0] : vector<8x128xf32> to vector<128xf32>
    %142 = vector.shape_cast %141 : vector<128xf32> to vector<1x128xf32>
    %cst_78 = arith.constant 8.000000e+00 : f32
    %143 = vector.broadcast %cst_78 : f32 to vector<1x128xf32>
    %144 = arith.divf %142, %143 : vector<1x128xf32>
    %145 = vector.broadcast %144 : vector<1x128xf32> to vector<8x128xf32>
    %146 = arith.subf %140, %145 : vector<8x128xf32>
    %147 = arith.mulf %146, %146 : vector<8x128xf32>
    %cst_79 = arith.constant dense<0.000000e+00> : vector<128xf32>
    %148 = vector.multi_reduction <add>, %147, %cst_79 [0] : vector<8x128xf32> to vector<128xf32>
    %149 = vector.shape_cast %148 : vector<128xf32> to vector<1x128xf32>
    %cst_80 = arith.constant 8.000000e+00 : f32
    %150 = vector.broadcast %cst_80 : f32 to vector<1x128xf32>
    %151 = arith.divf %149, %150 : vector<1x128xf32>
    %c5_81 = arith.constant 5 : index
    %c0_82 = arith.constant 0 : index
    %152 = vector.load %arg2[%c5_81, %c0_82] : memref<9x128xf32, #tpu.memory_space<vmem>>, vector<1x128xf32>
    %cst_83 = arith.constant 9.99999974E-6 : f32
    %153 = vector.broadcast %cst_83 : f32 to vector<1x128xf32>
    %154 = arith.addf %151, %153 : vector<1x128xf32>
    %155 = math.rsqrt %154 : vector<1x128xf32>
    %156 = arith.mulf %152, %155 : vector<1x128xf32>
    %157 = vector.broadcast %156 : vector<1x128xf32> to vector<8x128xf32>
    %158 = arith.mulf %146, %157 : vector<8x128xf32>
    %c5_84 = arith.constant 5 : index
    %c0_85 = arith.constant 0 : index
    %159 = vector.load %arg3[%c5_84, %c0_85] : memref<9x128xf32, #tpu.memory_space<vmem>>, vector<1x128xf32>
    %160 = vector.broadcast %159 : vector<1x128xf32> to vector<8x128xf32>
    %161 = arith.addf %158, %160 : vector<8x128xf32>
    %c0_86 = arith.constant 0 : index
    %c0_87 = arith.constant 0 : index
    %162 = vector.load %arg9[%c0_86, %c0_87] : memref<8x128xf32, #tpu.memory_space<vmem>>, vector<8x128xf32>
    tpu.vector_store %arg9[%c0_86, %c0_87], %161 {strides = array<i32>} : memref<8x128xf32, #tpu.memory_space<vmem>>, vector<8x128xf32>,
    %163 = arith.truncf %161 : vector<8x128xf32> to vector<8x128xbf16>
    %c6 = arith.constant 6 : index
    %c0_88 = arith.constant 0 : index
    %c0_89 = arith.constant 0 : index
    %164 = vector.load %arg1[%c6, %c0_88, %c0_89] : memref<10x128x128xbf16, #tpu.memory_space<vmem>>, vector<1x128x128xbf16>
    %165 = vector.shape_cast %164 : vector<1x128x128xbf16> to vector<128x128xbf16>
    %cst_90 = arith.constant dense<0.000000e+00> : vector<8x128xf32>
    %166 = tpu.matmul %163, %165, %cst_90 {dimension_numbers = #tpu.dot_dimension_numbers<[1], [0], [0], [1], [0, 0, 1, 1], [], []>} : vector<8x128xbf16>, vector<128x128xbf16>, vector<8x128xf32> -> vector<8x128xf32>
    %cst_91 = arith.constant dense<0.000000e+00> : vector<128xf32>
    %167 = vector.multi_reduction <add>, %166, %cst_91 [0] : vector<8x128xf32> to vector<128xf32>
    %168 = vector.shape_cast %167 : vector<128xf32> to vector<1x128xf32>
    %cst_92 = arith.constant 8.000000e+00 : f32
    %169 = vector.broadcast %cst_92 : f32 to vector<1x128xf32>
    %170 = arith.divf %168, %169 : vector<1x128xf32>
    %171 = vector.broadcast %170 : vector<1x128xf32> to vector<8x128xf32>
    %172 = arith.subf %166, %171 : vector<8x128xf32>
    %173 = arith.mulf %172, %172 : vector<8x128xf32>
    %cst_93 = arith.constant dense<0.000000e+00> : vector<128xf32>
    %174 = vector.multi_reduction <add>, %173, %cst_93 [0] : vector<8x128xf32> to vector<128xf32>
    %175 = vector.shape_cast %174 : vector<128xf32> to vector<1x128xf32>
    %cst_94 = arith.constant 8.000000e+00 : f32
    %176 = vector.broadcast %cst_94 : f32 to vector<1x128xf32>
    %177 = arith.divf %175, %176 : vector<1x128xf32>
    %c6_95 = arith.constant 6 : index
    %c0_96 = arith.constant 0 : index
    %178 = vector.load %arg2[%c6_95, %c0_96] : memref<9x128xf32, #tpu.memory_space<vmem>>, vector<1x128xf32>
    %cst_97 = arith.constant 9.99999974E-6 : f32
    %179 = vector.broadcast %cst_97 : f32 to vector<1x128xf32>
    %180 = arith.addf %177, %179 : vector<1x128xf32>
    %181 = math.rsqrt %180 : vector<1x128xf32>
    %182 = arith.mulf %178, %181 : vector<1x128xf32>
    %183 = vector.broadcast %182 : vector<1x128xf32> to vector<8x128xf32>
    %184 = arith.mulf %172, %183 : vector<8x128xf32>
    %c6_98 = arith.constant 6 : index
    %c0_99 = arith.constant 0 : index
    %185 = vector.load %arg3[%c6_98, %c0_99] : memref<9x128xf32, #tpu.memory_space<vmem>>, vector<1x128xf32>
    %186 = vector.broadcast %185 : vector<1x128xf32> to vector<8x128xf32>
    %187 = arith.addf %184, %186 : vector<8x128xf32>
    %cst_100 = arith.constant 0.000000e+00 : f32
    %188 = vector.broadcast %cst_100 : f32 to vector<8x128xf32>
    %189 = arith.maximumf %187, %188 : vector<8x128xf32>
    %190 = arith.truncf %189 : vector<8x128xf32> to vector<8x128xbf16>
    %c7 = arith.constant 7 : index
    %c0_101 = arith.constant 0 : index
    %c0_102 = arith.constant 0 : index
    %191 = vector.load %arg1[%c7, %c0_101, %c0_102] : memref<10x128x128xbf16, #tpu.memory_space<vmem>>, vector<1x128x128xbf16>
    %192 = vector.shape_cast %191 : vector<1x128x128xbf16> to vector<128x128xbf16>
    %cst_103 = arith.constant dense<0.000000e+00> : vector<8x128xf32>
    %193 = tpu.matmul %190, %192, %cst_103 {dimension_numbers = #tpu.dot_dimension_numbers<[1], [0], [0], [1], [0, 0, 1, 1], [], []>} : vector<8x128xbf16>, vector<128x128xbf16>, vector<8x128xf32> -> vector<8x128xf32>
    %cst_104 = arith.constant dense<0.000000e+00> : vector<128xf32>
    %194 = vector.multi_reduction <add>, %193, %cst_104 [0] : vector<8x128xf32> to vector<128xf32>
    %195 = vector.shape_cast %194 : vector<128xf32> to vector<1x128xf32>
    %cst_105 = arith.constant 8.000000e+00 : f32
    %196 = vector.broadcast %cst_105 : f32 to vector<1x128xf32>
    %197 = arith.divf %195, %196 : vector<1x128xf32>
    %198 = vector.broadcast %197 : vector<1x128xf32> to vector<8x128xf32>
    %199 = arith.subf %193, %198 : vector<8x128xf32>
    %200 = arith.mulf %199, %199 : vector<8x128xf32>
    %cst_106 = arith.constant dense<0.000000e+00> : vector<128xf32>
    %201 = vector.multi_reduction <add>, %200, %cst_106 [0] : vector<8x128xf32> to vector<128xf32>
    %202 = vector.shape_cast %201 : vector<128xf32> to vector<1x128xf32>
    %cst_107 = arith.constant 8.000000e+00 : f32
    %203 = vector.broadcast %cst_107 : f32 to vector<1x128xf32>
    %204 = arith.divf %202, %203 : vector<1x128xf32>
    %c7_108 = arith.constant 7 : index
    %c0_109 = arith.constant 0 : index
    %205 = vector.load %arg2[%c7_108, %c0_109] : memref<9x128xf32, #tpu.memory_space<vmem>>, vector<1x128xf32>
    %cst_110 = arith.constant 9.99999974E-6 : f32
    %206 = vector.broadcast %cst_110 : f32 to vector<1x128xf32>
    %207 = arith.addf %204, %206 : vector<1x128xf32>
    %208 = math.rsqrt %207 : vector<1x128xf32>
    %209 = arith.mulf %205, %208 : vector<1x128xf32>
    %210 = vector.broadcast %209 : vector<1x128xf32> to vector<8x128xf32>
    %211 = arith.mulf %199, %210 : vector<8x128xf32>
    %c7_111 = arith.constant 7 : index
    %c0_112 = arith.constant 0 : index
    %212 = vector.load %arg3[%c7_111, %c0_112] : memref<9x128xf32, #tpu.memory_space<vmem>>, vector<1x128xf32>
    %213 = vector.broadcast %212 : vector<1x128xf32> to vector<8x128xf32>
    %214 = arith.addf %211, %213 : vector<8x128xf32>
    %cst_113 = arith.constant 0.000000e+00 : f32
    %215 = vector.broadcast %cst_113 : f32 to vector<8x128xf32>
    %216 = arith.maximumf %214, %215 : vector<8x128xf32>
    %217 = arith.truncf %216 : vector<8x128xf32> to vector<8x128xbf16>
    %c8 = arith.constant 8 : index
    %c0_114 = arith.constant 0 : index
    %c0_115 = arith.constant 0 : index
    %218 = vector.load %arg1[%c8, %c0_114, %c0_115] : memref<10x128x128xbf16, #tpu.memory_space<vmem>>, vector<1x128x128xbf16>
    %219 = vector.shape_cast %218 : vector<1x128x128xbf16> to vector<128x128xbf16>
    %cst_116 = arith.constant dense<0.000000e+00> : vector<8x128xf32>
    %220 = tpu.matmul %217, %219, %cst_116 {dimension_numbers = #tpu.dot_dimension_numbers<[1], [0], [0], [1], [0, 0, 1, 1], [], []>} : vector<8x128xbf16>, vector<128x128xbf16>, vector<8x128xf32> -> vector<8x128xf32>
    %cst_117 = arith.constant dense<0.000000e+00> : vector<128xf32>
    %221 = vector.multi_reduction <add>, %220, %cst_117 [0] : vector<8x128xf32> to vector<128xf32>
    %222 = vector.shape_cast %221 : vector<128xf32> to vector<1x128xf32>
    %cst_118 = arith.constant 8.000000e+00 : f32
    %223 = vector.broadcast %cst_118 : f32 to vector<1x128xf32>
    %224 = arith.divf %222, %223 : vector<1x128xf32>
    %225 = vector.broadcast %224 : vector<1x128xf32> to vector<8x128xf32>
    %226 = arith.subf %220, %225 : vector<8x128xf32>
    %227 = arith.mulf %226, %226 : vector<8x128xf32>
    %cst_119 = arith.constant dense<0.000000e+00> : vector<128xf32>
    %228 = vector.multi_reduction <add>, %227, %cst_119 [0] : vector<8x128xf32> to vector<128xf32>
    %229 = vector.shape_cast %228 : vector<128xf32> to vector<1x128xf32>
    %cst_120 = arith.constant 8.000000e+00 : f32
    %230 = vector.broadcast %cst_120 : f32 to vector<1x128xf32>
    %231 = arith.divf %229, %230 : vector<1x128xf32>
    %c8_121 = arith.constant 8 : index
    %c0_122 = arith.constant 0 : index
    %232 = vector.load %arg2[%c8_121, %c0_122] : memref<9x128xf32, #tpu.memory_space<vmem>>, vector<1x128xf32>
    %cst_123 = arith.constant 9.99999974E-6 : f32
    %233 = vector.broadcast %cst_123 : f32 to vector<1x128xf32>
    %234 = arith.addf %231, %233 : vector<1x128xf32>
    %235 = math.rsqrt %234 : vector<1x128xf32>
    %236 = arith.mulf %232, %235 : vector<1x128xf32>
    %237 = vector.broadcast %236 : vector<1x128xf32> to vector<8x128xf32>
    %238 = arith.mulf %226, %237 : vector<8x128xf32>
    %c8_124 = arith.constant 8 : index
    %c0_125 = arith.constant 0 : index
    %239 = vector.load %arg3[%c8_124, %c0_125] : memref<9x128xf32, #tpu.memory_space<vmem>>, vector<1x128xf32>
    %240 = vector.broadcast %239 : vector<1x128xf32> to vector<8x128xf32>
    %241 = arith.addf %238, %240 : vector<8x128xf32>
    %cst_126 = arith.constant 0.000000e+00 : f32
    %242 = vector.broadcast %cst_126 : f32 to vector<8x128xf32>
    %243 = arith.maximumf %241, %242 : vector<8x128xf32>
    %c0_127 = arith.constant 0 : index
    %c0_128 = arith.constant 0 : index
    %244 = vector.load %arg12[%c0_127, %c0_128] : memref<8x128xf32, #tpu.memory_space<vmem>>, vector<8x128xf32>
    tpu.vector_store %arg12[%c0_127, %c0_128], %243 {strides = array<i32>} : memref<8x128xf32, #tpu.memory_space<vmem>>, vector<8x128xf32>,
    %245 = arith.truncf %243 : vector<8x128xf32> to vector<8x128xbf16>
    %c9 = arith.constant 9 : index
    %c0_129 = arith.constant 0 : index
    %c0_130 = arith.constant 0 : index
    %246 = vector.load %arg1[%c9, %c0_129, %c0_130] : memref<10x128x128xbf16, #tpu.memory_space<vmem>>, vector<1x128x128xbf16>
    %247 = vector.shape_cast %246 : vector<1x128x128xbf16> to vector<128x128xbf16>
    %cst_131 = arith.constant dense<0.000000e+00> : vector<8x128xf32>
    %248 = tpu.matmul %245, %247, %cst_131 {dimension_numbers = #tpu.dot_dimension_numbers<[1], [0], [0], [1], [0, 0, 1, 1], [], []>} : vector<8x128xbf16>, vector<128x128xbf16>, vector<8x128xf32> -> vector<8x128xf32>
    %c0_132 = arith.constant 0 : index
    %c0_133 = arith.constant 0 : index
    %249 = vector.load %arg4[%c0_132, %c0_133] : memref<1x128xf32, #tpu.memory_space<vmem>>, vector<1x128xf32>
    %250 = vector.broadcast %249 : vector<1x128xf32> to vector<8x128xf32>
    %251 = arith.addf %248, %250 : vector<8x128xf32>
    %c0_134 = arith.constant 0 : index
    %c0_135 = arith.constant 0 : index
    %252 = vector.load %arg5[%c0_134, %c0_135] : memref<8x128xf32, #tpu.memory_space<vmem>>, vector<8x128xf32>
    tpu.vector_store %arg5[%c0_134, %c0_135], %251 {strides = array<i32>} : memref<8x128xf32, #tpu.memory_space<vmem>>, vector<8x128xf32>,
    return
  }
}

</mosaic_0001>

<bundles_post_ra>
// kernel: ae_forward.1
= control target key start
LH: loop header
LB: loop body
LE: loop exit
PB: predicated region body
PF: predicated region fallthrough
CT: control target
= control target key end

     0   :  { %18 = vsyncpa [#allocation3], 0  ;;  %s2163_s0 = inlined_call_operand.hbm [shape: f32[8,32], index: 0, kind: input, shape index: {}]   ;;  %s2164_s1 = inlined_call_operand.hbm [shape: bf16[10,128,128], index: 1, kind: input, shape index: {}]   ;;  %s2165_s2 = inlined_call_operand.hbm [shape: f32[9,128], index: 2, kind: input, shape index: {}]   ;;  %s2166_s3 = inlined_call_operand.hbm [shape: f32[9,128], index: 3, kind: input, shape index: {}]   ;;  %s2167_s4 = inlined_call_operand.vmem [shape: f32[1,128], index: 4, kind: input, shape index: {}]   ;;  %s2168_s5 = inlined_call_operand.hbm [shape: f32[8,128], index: 5, kind: output, shape index: {0}]   ;;  %s2169_s6 = inlined_call_operand.hbm [shape: f32[8,128], index: 6, kind: output, shape index: {1}]   ;;  %s2170_s7 = inlined_call_operand.hbm [shape: f32[8,128], index: 7, kind: output, shape index: {2}]   ;;  %s2171_s8 = inlined_call_operand.hbm [shape: f32[8,128], index: 8, kind: output, shape index: {3}]   ;;  %s2172_s9 = inlined_call_operand.hbm [shape: f32[8,128], index: 9, kind: output, shape index: {4}]   ;;  %s2173_s10 = inlined_call_operand.hbm [shape: f32[8,128], index: 10, kind: output, shape index: {5}]   ;;  %s2174_s11 = inlined_call_operand.hbm [shape: f32[8,128], index: 11, kind: output, shape index: {6}]   ;;  %s2175_s12 = inlined_call_operand.hbm [shape: f32[8,128], index: 12, kind: output, shape index: {7}]  }
   0x1   :  { %19 = vsyncpa [#allocation6], 0 }
   0x2   :  { %20 = vsyncpa [#allocation9], 0 }
   0x3   :  { %21 = vsyncpa [#allocation4], 0 }
   0x4   :  { %22 = vsyncpa [#allocation12], 0 }
   0x5   :  { %23 = vsyncpa [#allocation15], 0 }
   0x6   :  { %24 = vsyncpa [#allocation18], 0  ;;  %s41_s23 = sshll.u32 %s2164_s1, 4  ;;  %s42_s23 = int_to_ptr.hbm [resolvable:$true] %s41_s23 }
   0x7   :  { %25 = vsyncpa [#allocation21], 0  ;;  %s2022_s24 = smov [#allocation5]   ;;  %s31_s28 = sshll.u32 %s2163_s0, 4  ;;  %s32_s28 = int_to_ptr.hbm [resolvable:$true] %s31_s28 }
   0x8   :  { %s43_s25 = sshll.u32 %s2022_s24, 4  ;;  %s2023_s29 = smov 64   ;;  %s44_s25 = int_to_ptr.vmem [resolvable:$true] %s43_s25 }
   0x9   :  { %s2024_s30 = smov 4   ;;  %s2025_s13 = smov [#allocation2]  }
   0xa   :  { %49 = dma.hbm_to_vmem [thread:$0]  %s42_s23, 10240, %s44_s25, [#allocation6], %s2023_s29, %s2023_s29, %s2024_s30  }
   0xb   :  { %s33_s14 = sshll.u32 %s2025_s13, 4  ;;  %s54_s17 = sshll.u32 %s2165_s2, 4  ;;  %s34_s14 = int_to_ptr.vmem [resolvable:$true] %s33_s14  ;;  %s55_s17 = int_to_ptr.hbm [resolvable:$true] %s54_s17 }
   0xc   :  { %36 = dma.hbm_to_vmem [thread:$0]  %s32_s28, 128, %s34_s14, [#allocation3]  }
   0xd   :  { %s2026_s1 = smov [#allocation7]   ;;  %s67_s0 = sshll.u32 %s2166_s3, 4  ;;  %s68_s0 = int_to_ptr.hbm [resolvable:$true] %s67_s0 }
   0xe   :  { %s56_s18 = sshll.u32 %s2026_s1, 4  ;;  %s2027_s21 = smov 128   ;;  %s57_s18 = int_to_ptr.vmem [resolvable:$true] %s56_s18 }
   0xf   :  { %s2028_s22 = smov 8   ;;  %s2029_s23 = smov [#allocation8]  }
  0x10   :  { %62 = dma.hbm_to_vmem [thread:$0]  %s55_s17, 256, %s57_s18, [#allocation6], %s2027_s21, %s2027_s21, %s2028_s22  }
  0x11   :  { %s69_s24 = sshll.u32 %s2029_s23, 4  ;;  %s70_s24 = int_to_ptr.vmem [resolvable:$true] %s69_s24 }
  0x12   :  { %75 = dma.hbm_to_vmem [thread:$0]  %s68_s0, 256, %s70_s24, [#allocation9], %s2027_s21, %s2027_s21, %s2028_s22  }
  0x13   :  { %2006 = dma.done.wait [#allocation3], 128  }
  0x14   :  { %2007 = vsyncadd [#allocation3], 4294967168 }
  0x15   :  { %2008 = dma.done.wait [#allocation6], 10496  }
  0x16   :  { %2009 = vsyncadd [#allocation6], 4294956800 }
  0x17   :  { %2010 = dma.done.wait [#allocation9], 256  }
  0x18   :  { %2011 = vsyncadd [#allocation9], 4294967040  ;;  %v1598_v0 = vld [vmem:[#allocation5 + $0x8] sm:$0xff]  ;;  %v1597_v1 = vld [vmem:[#allocation5] sm:$0xff]  ;;  %vm113_vm0 = vcmask 261120   ;;  %v2030_v4 = vmov 8.0  }
  0x19   :  { %v95_v2 = vld [vmem:[#allocation2] sm:$0xff]  ;;  %123 = vmatpush.bf16.msra.mxu0 %v1598_v0  ;;  %1698 = vrcp.f32 %v2030_v4  ;;  %v1605_v13 = vld [vmem:[#allocation5 + $0x70] sm:$0xff]  ;;  %v1604_v18 = vld [vmem:[#allocation5 + $0x68] sm:$0xff]  ;;  %s1190_s25 = sshll.u32 %s2169_s6, 4  ;;  %s2031_s26 = smov [#allocation11]   ;;  %s1191_s25 = int_to_ptr.hbm [resolvable:$true] %s1190_s25 }
  0x1a   :  { %v96_v3 = vpack.c.bf16 %v95_v2, %v95_v2  ;;  %v1606_v9 = vld [vmem:[#allocation5 + $0x78] sm:$0xff]  ;;  %v1603_v22 = vld [vmem:[#allocation5 + $0x60] sm:$0xff]  ;;  %v1601_v28 = vld [vmem:[#allocation5 + $0x50] sm:$0xff]  ;;  %s1188_s27 = sshll.u32 %s2031_s26, 4  ;;  %s2032_s28 = smov [#allocation14]   ;;  %s1189_s27 = int_to_ptr.vmem [resolvable:$true] %s1188_s27 }
  0x1b   :  { %239 = vmatpush.bf16.msra.mxu1 %v1606_v9  ;;  %v1602_v25 = vld [vmem:[#allocation5 + $0x58] sm:$0xff]  ;;  %v1600_v31 = vld [vmem:[#allocation5 + $0x48] sm:$0xff]  ;;  %v1599_v33 = vld [vmem:[#allocation5 + $0x40] sm:$0xff]  ;;  %s1210_s29 = sshll.u32 %s2032_s28, 4  ;;  %s1212_s14 = sshll.u32 %s2171_s8, 4  ;;  %s1211_s29 = int_to_ptr.vmem [resolvable:$true] %s1210_s29  ;;  %s1213_s14 = int_to_ptr.hbm [resolvable:$true] %s1212_s14 }
  0x1c   :  { %v153_v43 = vld [vmem:[#allocation7] sm:$0x1]  ;;  %v1688_v48 = vld [vmem:[#allocation8] ss:$0 sm:$0xff]  ;;  %v1614_v54 = vld [vmem:[#allocation5 + $0xb8] sm:$0xff]  ;;  %s1234_s17 = sshll.u32 %s2173_s10, 4  ;;  %s1235_s17 = int_to_ptr.hbm [resolvable:$true] %s1234_s17 }
  0x1d   :  { %124 = vmatpush.bf16.msra.mxu0 %v1597_v1  ;;  %354 = vmatpush.bf16.msra.mxu2 %v1614_v54  ;;  %v1613_v57 = vld [vmem:[#allocation5 + $0xb0] sm:$0xff]  ;;  %v1612_v61 = vld [vmem:[#allocation5 + $0xa8] sm:$0xff]  ;;  %v1611_v0 = vld [vmem:[#allocation5 + $0xa0] sm:$0xff]  ;;  %s2033_s1 = smov [#allocation17]   ;;  %s1201_s20 = sshll.u32 %s2170_s7, 4  ;;  %s1202_s20 = int_to_ptr.hbm [resolvable:$true] %s1201_s20 }
  0x1e   :  { %v1608_v9 = vld [vmem:[#allocation5 + $0x88] sm:$0xff]  ;;  %v1615_v54 = vld [vmem:[#allocation5 + $0xc0] sm:$0xff]  ;;  %s1232_s6 = sshll.u32 %s2033_s1, 4  ;;  %s2034_s0 = smov [#allocation13]   ;;  %s1233_s6 = int_to_ptr.vmem [resolvable:$true] %s1232_s6 }
  0x1f   :  { %v1699_v5 = vpop.eup %1698  ;;  %240 = vmatpush.bf16.msra.mxu1 %v1605_v13  ;;  %s1199_s21 = sshll.u32 %s2034_s0, 4  ;;  %s2035_s8 = smov [#allocation16]   ;;  %s1200_s21 = int_to_ptr.vmem [resolvable:$true] %s1199_s21 }
  0x20   :  { %1308 = vmatmul.msk.bf16.vlgmr.msra.gmra.mxu0 %vm113_vm0, %v96_v3  ;;  %v137_v6 = vmul.f32 8.0, %v1699_v5  ;;  %vm141_vm1 = vweird.f32 %v1699_v5  ;;  %v1610_v3 = vld [vmem:[#allocation5 + $0x98] sm:$0xff]  ;;  %s1221_s22 = sshll.u32 %s2035_s8, 4  ;;  %s1223_s10 = sshll.u32 %s2172_s9, 4  ;;  %s1222_s22 = int_to_ptr.vmem [resolvable:$true] %s1221_s22  ;;  %s1224_s10 = int_to_ptr.hbm [resolvable:$true] %s1223_s10 }
  0x21   :  { %355 = vmatpush.bf16.msra.mxu2 %v1613_v57  ;;  %s2036_s26 = smov [#allocation19]   ;;  %s1256_s13 = sshll.u32 %s2175_s12, 4  ;;  %s1257_s13 = int_to_ptr.hbm [resolvable:$true] %s1256_s13 }
  0x22   :  { %v138_v7 = vsub.f32 1.0, %v137_v6  ;;  %v1609_v6 = vld [vmem:[#allocation5 + $0x90] sm:$0xff]  ;;  %s1243_s7 = sshll.u32 %s2036_s26, 4  ;;  %s2038_s15 = smov [#allocation10]   ;;  %s1244_s7 = int_to_ptr.vmem [resolvable:$true] %s1243_s7 }
  0x23   :  { %241 = vmatpush.bf16.msra.mxu1 %v1604_v18  ;;  %s1179_s1 = sshll.u32 %s2168_s5, 4  ;;  %s1180_s1 = int_to_ptr.hbm [resolvable:$true] %s1179_s1 }
  0x24   :  { %v139_v11 = vmul.f32 %v1699_v5, %v138_v7 }
  0x25   :  { %356 = vmatpush.bf16.msra.mxu2 %v1612_v61 }
  0x26   :  { %v140_v15 = vadd.f32 %v1699_v5, %v139_v11  ;;  %v1607_v11 = vld [vmem:[#allocation5 + $0x80] sm:$0xff] }
  0x27   :  { %242 = vmatpush.bf16.msra.mxu1 %v1603_v22  ;;  %v268_v22 = vld [vmem:[#allocation7 + $0x1] sm:$0x1] }
  0x28   :  { %v2116_v20 = vsel %vm141_vm1, %v1699_v5, %v140_v15 }
  0x29   :  { %357 = vmatpush.bf16.msra.mxu2 %v1611_v0  ;;  %v383_v0 = vld [vmem:[#allocation7 + $0x2] sm:$0x1] }
  0x2b   :  { %243 = vmatpush.bf16.msra.mxu1 %v1602_v25 }
  0x2d   :  { %358 = vmatpush.bf16.msra.mxu2 %v1610_v3 }
  0x2f   :  { %244 = vmatpush.bf16.msra.mxu1 %v1601_v28 }
  0x31   :  { %359 = vmatpush.bf16.msra.mxu2 %v1609_v6 }
  0x33   :  { %245 = vmatpush.bf16.msra.mxu1 %v1600_v31 }
  0x35   :  { %360 = vmatpush.bf16.msra.mxu2 %v1608_v9 }
  0x37   :  { %246 = vmatpush.bf16.msra.mxu1 %v1599_v33  ;;  %v1622_v33 = vld [vmem:[#allocation5 + $0xf8] sm:$0xff] }
  0x38   :  { %469 = vmatpush.bf16.msra.mxu3 %v1622_v33  ;;  %v1623_v33 = vld [vmem:[#allocation5 + $0x100] sm:$0xff] }
  0x39   :  { %361 = vmatpush.bf16.msra.mxu2 %v1607_v11 }
  0x9d   :  { %v126_v8 = vpop.f32.mrf.mxu0 }
  0x9e   :  { %v130_v10 = vrot.slane %v126_v8, 4 }
  0xa0   :  { %v131_v12 = vadd.f32 %v130_v10, %v126_v8 }
  0xa2   :  { %v132_v14 = vrot.slane %v131_v12, 2 }
  0xa4   :  { %v133_v16 = vadd.f32 %v132_v14, %v131_v12 }
  0xa5   :  { %v128_v17 = vpop.f32.mrf.mxu0 }
  0xa6   :  { %v134_v19 = vrot.slane %v133_v16, 1 }
  0xa8   :  { %v135_v21 = vadd.f32 %v134_v19, %v133_v16 }
  0xaa   :  { %v143_v23 = vmul.f32 %v2116_v20, %v135_v21 }
  0xac   :  { %v144_v24 = vsub.f32 %v126_v8, %v143_v23 }
  0xae   :  { %v145_v26 = vmul.f32 %v144_v24, %v144_v24 }
  0xb0   :  { %v146_v27 = vrot.slane %v145_v26, 4 }
  0xb2   :  { %v147_v29 = vadd.f32 %v146_v27, %v145_v26  ;;  %v1689_v27 = vld [vmem:[#allocation8 + $0x1] ss:$0 sm:$0xff] }
  0xb4   :  { %v148_v30 = vrot.slane %v147_v29, 2 }
  0xb6   :  { %v149_v32 = vadd.f32 %v148_v30, %v147_v29 }
  0xb8   :  { %v150_v34 = vrot.slane %v149_v32, 1 }
  0xba   :  { %v151_v35 = vadd.f32 %v150_v34, %v149_v32 }
  0xbc   :  { %v152_v36 = vmul.f32 %v151_v35, %v2116_v20 }
  0xbe   :  { %v154_v37 = vadd.f32 1e-05, %v152_v36  ;;  %v1621_v36 = vld [vmem:[#allocation5 + $0xf0] sm:$0xff] }
  0xbf   :  { %470 = vmatpush.bf16.msra.mxu3 %v1621_v36 }
  0xc0   :  { %1700 = vrsqrt.f32 %v154_v37  ;;  %vm161_vm3 = vweird.f32 %v154_v37 }
  0xc6   :  { %v1701_v38 = vpop.eup %1700 }
  0xc7   :  { %v156_v39 = vmul.f32 %v1701_v38, %v154_v37  ;;  %vm162_vm2 = vweird.f32 %v1701_v38 }
  0xc8   :  { %vm163_vm4 = vmor %vm161_vm3, %vm162_vm2 }
  0xc9   :  { %v157_v40 = vmul.f32 %v1701_v38, %v156_v39 }
  0xcb   :  { %v158_v41 = vmul.f32 0.5, %v157_v40  ;;  %v1620_v40 = vld [vmem:[#allocation5 + $0xe8] sm:$0xff] }
  0xcc   :  { %471 = vmatpush.bf16.msra.mxu3 %v1620_v40 }
  0xcd   :  { %v159_v42 = vsub.f32 1.5, %v158_v41 }
  0xcf   :  { %v160_v44 = vmul.f32 %v1701_v38, %v159_v42 }
  0xd1   :  { %v164_v45 = vsel %vm163_vm4, %v1701_v38, %v160_v44 }
  0xd2   :  { %v165_v46 = vmul.f32 %v164_v45, %v153_v43  ;;  %v1619_v43 = vld [vmem:[#allocation5 + $0xe0] sm:$0xff] }
  0xd3   :  { %472 = vmatpush.bf16.msra.mxu3 %v1619_v43  ;;  %v498_v43 = vld [vmem:[#allocation7 + $0x3] sm:$0x1] }
  0xd4   :  { %v166_v47 = vperm.slane %v165_v46, 0  ;;  %v1618_v46 = vld [vmem:[#allocation5 + $0xd8] sm:$0xff] }
  0xd6   :  { %v167_v49 = vmul.f32 %v166_v47, %v144_v24 }
  0xd7   :  { %473 = vmatpush.bf16.msra.mxu3 %v1618_v46 }
  0xd8   :  { %v170_v50 = vadd.f32 %v1688_v48, %v167_v49  ;;  %v1617_v49 = vld [vmem:[#allocation5 + $0xd0] sm:$0xff] }
  0xda   :  { %v171_v51 = vmax.f32 %v170_v50, 0.0 }
  0xdb   :  { %474 = vmatpush.bf16.msra.mxu3 %v1617_v49 }
  0xdc   :  { %v173_v52 = vpack.c.bf16 %v171_v51, %v171_v51  ;;  %172 = vst [vmem:[#allocation11] sm:$0xff] %v171_v51 }
  0xdd   :  { %1193 = dma.vmem_to_hbm [thread:$0]  %s1189_s27, 128, %s1191_s25, [#allocation12]  }
  0xde   :  { %247 = vmatmul.bf16.vlgmr.msra.gmra.mxu1 %v173_v52  ;;  %v1616_v52 = vld [vmem:[#allocation5 + $0xc8] sm:$0xff]  ;;  %s1245_s25 = sshll.u32 %s2174_s11, 4  ;;  %s2037_s27 = smov [#allocation20]   ;;  %s1246_s25 = int_to_ptr.hbm [resolvable:$true] %s1245_s25 }
  0xdf   :  { %475 = vmatpush.bf16.msra.mxu3 %v1616_v52  ;;  %v1638_v52 = vld [vmem:[#allocation5 + $0x178] sm:$0xff]  ;;  %s1254_s28 = sshll.u32 %s2037_s27, 4  ;;  %s1177_s11 = sshll.u32 %s2038_s15, 4  ;;  %s1255_s28 = int_to_ptr.vmem [resolvable:$true] %s1254_s28  ;;  %s1178_s11 = int_to_ptr.vmem [resolvable:$true] %s1177_s11 }
  0xe0   :  { %697 = vmatpush.bf16.msrb.mxu1 %v1638_v52  ;;  %v1639_v52 = vld [vmem:[#allocation5 + $0x180] sm:$0xff] }
  0xe3   :  { %476 = vmatpush.bf16.msra.mxu3 %v1615_v54 }
 0x15b   :  { %v248_v53 = vpop.f32.mrf.mxu1 }
 0x15c   :  { %v252_v55 = vrot.slane %v248_v53, 4 }
 0x15e   :  { %v253_v56 = vadd.f32 %v252_v55, %v248_v53 }
 0x160   :  { %v254_v58 = vrot.slane %v253_v56, 2 }
 0x162   :  { %v255_v59 = vadd.f32 %v254_v58, %v253_v56 }
 0x163   :  { %v250_v60 = vpop.f32.mrf.mxu1 }
 0x164   :  { %v256_v62 = vrot.slane %v255_v59, 1 }
 0x166   :  { %v257_v63 = vadd.f32 %v256_v62, %v255_v59 }
 0x168   :  { %v258_v1 = vmul.f32 %v257_v63, %v2116_v20 }
 0x16a   :  { %v259_v2 = vsub.f32 %v248_v53, %v258_v1 }
 0x16c   :  { %v260_v4 = vmul.f32 %v259_v2, %v259_v2 }
 0x16e   :  { %v261_v5 = vrot.slane %v260_v4, 4 }
 0x170   :  { %v262_v7 = vadd.f32 %v261_v5, %v260_v4  ;;  %v1690_v5 = vld [vmem:[#allocation8 + $0x2] ss:$0 sm:$0xff] }
 0x172   :  { %v263_v8 = vrot.slane %v262_v7, 2 }
 0x174   :  { %v264_v10 = vadd.f32 %v263_v8, %v262_v7 }
 0x176   :  { %v265_v12 = vrot.slane %v264_v10, 1 }
 0x178   :  { %v266_v13 = vadd.f32 %v265_v12, %v264_v10  ;;  %v1630_v10 = vld [vmem:[#allocation5 + $0x138] sm:$0xff] }
 0x179   :  { %583 = vmatpush.bf16.msrb.mxu0 %v1630_v10  ;;  %v1631_v10 = vld [vmem:[#allocation5 + $0x140] sm:$0xff] }
 0x17a   :  { %v267_v14 = vmul.f32 %v266_v13, %v2116_v20  ;;  %v1629_v13 = vld [vmem:[#allocation5 + $0x130] sm:$0xff] }
 0x17c   :  { %v269_v15 = vadd.f32 1e-05, %v267_v14 }
 0x17d   :  { %584 = vmatpush.bf16.msrb.mxu0 %v1629_v13 }
 0x17e   :  { %1702 = vrsqrt.f32 %v269_v15  ;;  %vm276_vm6 = vweird.f32 %v269_v15 }
 0x184   :  { %v1703_v16 = vpop.eup %1702 }
 0x185   :  { %v271_v17 = vmul.f32 %v1703_v16, %v269_v15  ;;  %vm277_vm5 = vweird.f32 %v1703_v16 }
 0x186   :  { %vm278_vm7 = vmor %vm276_vm6, %vm277_vm5 }
 0x187   :  { %v272_v18 = vmul.f32 %v1703_v16, %v271_v17 }
 0x189   :  { %v273_v19 = vmul.f32 0.5, %v272_v18 }
 0x18b   :  { %v274_v21 = vsub.f32 1.5, %v273_v19 }
 0x18d   :  { %v275_v23 = vmul.f32 %v1703_v16, %v274_v21  ;;  %v1627_v21 = vld [vmem:[#allocation5 + $0x120] sm:$0xff] }
 0x18f   :  { %v279_v24 = vsel %vm278_vm7, %v1703_v16, %v275_v23  ;;  %v1628_v16 = vld [vmem:[#allocation5 + $0x128] sm:$0xff] }
 0x190   :  { %v280_v25 = vmul.f32 %v279_v24, %v268_v22  ;;  %585 = vmatpush.bf16.msrb.mxu0 %v1628_v16  ;;  %v1626_v24 = vld [vmem:[#allocation5 + $0x118] sm:$0xff] }
 0x192   :  { %v281_v26 = vperm.slane %v280_v25, 0 }
 0x194   :  { %v282_v28 = vmul.f32 %v281_v26, %v259_v2  ;;  %586 = vmatpush.bf16.msrb.mxu0 %v1627_v21  ;;  %v612_v21 = vld [vmem:[#allocation7 + $0x4] sm:$0x1] }
 0x196   :  { %v285_v29 = vadd.f32 %v1689_v27, %v282_v28  ;;  %v1625_v27 = vld [vmem:[#allocation5 + $0x110] sm:$0xff] }
 0x198   :  { %v286_v30 = vmax.f32 %v285_v29, 0.0  ;;  %587 = vmatpush.bf16.msrb.mxu0 %v1626_v24 }
 0x19a   :  { %287 = vst [vmem:[#allocation13] sm:$0xff] %v286_v30  ;;  %v288_v31 = vpack.c.bf16 %v286_v30, %v286_v30  ;;  %v1624_v30 = vld [vmem:[#allocation5 + $0x108] sm:$0xff] }
 0x19b   :  { %1204 = dma.vmem_to_hbm [thread:$0]  %s1200_s21, 128, %s1202_s20, [#allocation12]  }
 0x19c   :  { %362 = vmatmul.bf16.vlgmr.msra.gmra.mxu2 %v288_v31  ;;  %588 = vmatpush.bf16.msrb.mxu0 %v1625_v27 }
 0x1a0   :  { %589 = vmatpush.bf16.msrb.mxu0 %v1624_v30  ;;  %v1646_v30 = vld [vmem:[#allocation5 + $0x1b8] sm:$0xff] }
 0x1a1   :  { %811 = vmatpush.bf16.msrb.mxu2 %v1646_v30  ;;  %v1647_v30 = vld [vmem:[#allocation5 + $0x1c0] sm:$0xff] }
 0x1a4   :  { %590 = vmatpush.bf16.msrb.mxu0 %v1623_v33  ;;  %v1645_v33 = vld [vmem:[#allocation5 + $0x1b0] sm:$0xff] }
 0x1a5   :  { %812 = vmatpush.bf16.msrb.mxu2 %v1645_v33 }
 0x21f   :  { %v363_v32 = vpop.f32.mrf.mxu2 }
 0x220   :  { %v367_v34 = vrot.slane %v363_v32, 4 }
 0x222   :  { %v368_v35 = vadd.f32 %v367_v34, %v363_v32 }
 0x224   :  { %v369_v37 = vrot.slane %v368_v35, 2 }
 0x226   :  { %v370_v38 = vadd.f32 %v369_v37, %v368_v35 }
 0x227   :  { %v365_v39 = vpop.f32.mrf.mxu2 }
 0x228   :  { %v371_v41 = vrot.slane %v370_v38, 1 }
 0x22a   :  { %v372_v42 = vadd.f32 %v371_v41, %v370_v38 }
 0x22c   :  { %v373_v44 = vmul.f32 %v372_v42, %v2116_v20 }
 0x22e   :  { %v374_v45 = vsub.f32 %v363_v32, %v373_v44 }
 0x230   :  { %v375_v47 = vmul.f32 %v374_v45, %v374_v45 }
 0x232   :  { %v376_v48 = vrot.slane %v375_v47, 4 }
 0x234   :  { %v377_v50 = vadd.f32 %v376_v48, %v375_v47  ;;  %v1691_v48 = vld [vmem:[#allocation8 + $0x3] ss:$0 sm:$0xff] }
 0x236   :  { %v378_v51 = vrot.slane %v377_v50, 2 }
 0x238   :  { %v379_v53 = vadd.f32 %v378_v51, %v377_v50 }
 0x23a   :  { %v380_v55 = vrot.slane %v379_v53, 1 }
 0x23c   :  { %v381_v56 = vadd.f32 %v380_v55, %v379_v53  ;;  %v1637_v55 = vld [vmem:[#allocation5 + $0x170] sm:$0xff] }
 0x23d   :  { %698 = vmatpush.bf16.msrb.mxu1 %v1637_v55 }
 0x23e   :  { %v382_v57 = vmul.f32 %v381_v56, %v2116_v20 }
 0x240   :  { %v384_v58 = vadd.f32 1e-05, %v382_v57 }
 0x242   :  { %1704 = vrsqrt.f32 %v384_v58  ;;  %vm391_vm9 = vweird.f32 %v384_v58 }
 0x248   :  { %v1705_v59 = vpop.eup %1704 }
 0x249   :  { %v386_v60 = vmul.f32 %v1705_v59, %v384_v58  ;;  %vm392_vm8 = vweird.f32 %v1705_v59  ;;  %v1636_v58 = vld [vmem:[#allocation5 + $0x168] sm:$0xff] }
 0x24a   :  { %vm393_vm10 = vmor %vm391_vm9, %vm392_vm8  ;;  %699 = vmatpush.bf16.msrb.mxu1 %v1636_v58 }
 0x24b   :  { %v387_v61 = vmul.f32 %v1705_v59, %v386_v60 }
 0x24d   :  { %v388_v62 = vmul.f32 0.5, %v387_v61 }
 0x24f   :  { %v389_v63 = vsub.f32 1.5, %v388_v62  ;;  %v1635_v62 = vld [vmem:[#allocation5 + $0x160] sm:$0xff] }
 0x250   :  { %700 = vmatpush.bf16.msrb.mxu1 %v1635_v62  ;;  %v726_v62 = vld [vmem:[#allocation7 + $0x5] sm:$0x1] }
 0x251   :  { %v390_v1 = vmul.f32 %v1705_v59, %v389_v63 }
 0x253   :  { %v394_v2 = vsel %vm393_vm10, %v1705_v59, %v390_v1  ;;  %v1634_v1 = vld [vmem:[#allocation5 + $0x158] sm:$0xff] }
 0x254   :  { %v395_v3 = vmul.f32 %v394_v2, %v383_v0  ;;  %701 = vmatpush.bf16.msrb.mxu1 %v1634_v1 }
 0x256   :  { %v396_v4 = vperm.slane %v395_v3, 0 }
 0x258   :  { %v397_v6 = vmul.f32 %v396_v4, %v374_v45  ;;  %v1633_v4 = vld [vmem:[#allocation5 + $0x150] sm:$0xff] }
 0x259   :  { %702 = vmatpush.bf16.msrb.mxu1 %v1633_v4 }
 0x25a   :  { %v400_v7 = vadd.f32 %v1690_v5, %v397_v6 }
 0x25c   :  { %v401_v8 = vmax.f32 %v400_v7, 0.0  ;;  %v1632_v7 = vld [vmem:[#allocation5 + $0x148] sm:$0xff] }
 0x25d   :  { %703 = vmatpush.bf16.msrb.mxu1 %v1632_v7 }
 0x25e   :  { %v403_v9 = vpack.c.bf16 %v401_v8, %v401_v8  ;;  %402 = vst [vmem:[#allocation14] sm:$0xff] %v401_v8 }
 0x25f   :  { %1215 = dma.vmem_to_hbm [thread:$0]  %s1211_s29, 128, %s1213_s14, [#allocation15]  }
 0x260   :  { %477 = vmatmul.bf16.vlgmr.msra.gmra.mxu3 %v403_v9 }
 0x261   :  { %704 = vmatpush.bf16.msrb.mxu1 %v1631_v10 }
 0x2e3   :  { %v478_v11 = vpop.f32.mrf.mxu3 }
 0x2e4   :  { %v482_v12 = vrot.slane %v478_v11, 4 }
 0x2e6   :  { %v483_v14 = vadd.f32 %v482_v12, %v478_v11 }
 0x2e8   :  { %v484_v15 = vrot.slane %v483_v14, 2 }
 0x2ea   :  { %v485_v17 = vadd.f32 %v484_v15, %v483_v14 }
 0x2eb   :  { %v480_v18 = vpop.f32.mrf.mxu3 }
 0x2ec   :  { %v486_v19 = vrot.slane %v485_v17, 1 }
 0x2ee   :  { %v487_v22 = vadd.f32 %v486_v19, %v485_v17 }
 0x2f0   :  { %v488_v23 = vmul.f32 %v487_v22, %v2116_v20 }
 0x2f2   :  { %v489_v25 = vsub.f32 %v478_v11, %v488_v23 }
 0x2f4   :  { %v490_v26 = vmul.f32 %v489_v25, %v489_v25 }
 0x2f6   :  { %v491_v28 = vrot.slane %v490_v26, 4 }
 0x2f8   :  { %v492_v29 = vadd.f32 %v491_v28, %v490_v26  ;;  %v1692_v26 = vld [vmem:[#allocation8 + $0x4] ss:$0 sm:$0xff] }
 0x2fa   :  { %v493_v31 = vrot.slane %v492_v29, 2 }
 0x2fc   :  { %v494_v32 = vadd.f32 %v493_v31, %v492_v29 }
 0x2fe   :  { %v495_v34 = vrot.slane %v494_v32, 1 }
 0x300   :  { %v496_v35 = vadd.f32 %v495_v34, %v494_v32 }
 0x302   :  { %v497_v36 = vmul.f32 %v496_v35, %v2116_v20 }
 0x304   :  { %v499_v37 = vadd.f32 1e-05, %v497_v36  ;;  %v1644_v36 = vld [vmem:[#allocation5 + $0x1a8] sm:$0xff] }
 0x305   :  { %813 = vmatpush.bf16.msrb.mxu2 %v1644_v36 }
 0x306   :  { %1706 = vrsqrt.f32 %v499_v37  ;;  %vm506_vm12 = vweird.f32 %v499_v37 }
 0x30c   :  { %v1707_v38 = vpop.eup %1706 }
 0x30d   :  { %v501_v39 = vmul.f32 %v1707_v38, %v499_v37  ;;  %vm507_vm11 = vweird.f32 %v1707_v38 }
 0x30e   :  { %vm508_vm13 = vmor %vm506_vm12, %vm507_vm11 }
 0x30f   :  { %v502_v40 = vmul.f32 %v1707_v38, %v501_v39 }
 0x311   :  { %v503_v41 = vmul.f32 0.5, %v502_v40  ;;  %v1643_v40 = vld [vmem:[#allocation5 + $0x1a0] sm:$0xff] }
 0x312   :  { %814 = vmatpush.bf16.msrb.mxu2 %v1643_v40  ;;  %v840_v40 = vld [vmem:[#allocation7 + $0x6] sm:$0x1] }
 0x313   :  { %v504_v42 = vsub.f32 1.5, %v503_v41 }
 0x315   :  { %v505_v44 = vmul.f32 %v1707_v38, %v504_v42 }
 0x317   :  { %v509_v45 = vsel %vm508_vm13, %v1707_v38, %v505_v44 }
 0x318   :  { %v510_v46 = vmul.f32 %v509_v45, %v498_v43  ;;  %v1642_v43 = vld [vmem:[#allocation5 + $0x198] sm:$0xff] }
 0x319   :  { %815 = vmatpush.bf16.msrb.mxu2 %v1642_v43 }
 0x31a   :  { %v511_v47 = vperm.slane %v510_v46, 0  ;;  %v1641_v46 = vld [vmem:[#allocation5 + $0x190] sm:$0xff] }
 0x31c   :  { %v512_v49 = vmul.f32 %v511_v47, %v489_v25 }
 0x31d   :  { %816 = vmatpush.bf16.msrb.mxu2 %v1641_v46 }
 0x31e   :  { %v515_v50 = vadd.f32 %v1691_v48, %v512_v49  ;;  %v1640_v49 = vld [vmem:[#allocation5 + $0x188] sm:$0xff] }
 0x320   :  { %v517_v51 = vpack.c.bf16 %v515_v50, %v515_v50  ;;  %516 = vst [vmem:[#allocation19] sm:$0xff] %v515_v50 }
 0x321   :  { %817 = vmatpush.bf16.msrb.mxu2 %v1640_v49 }
 0x322   :  { %591 = vmatmul.bf16.vlgmr.msrb.gmra.mxu0 %v517_v51 }
 0x325   :  { %818 = vmatpush.bf16.msrb.mxu2 %v1639_v52 }
 0x39f   :  { %v592_v53 = vpop.f32.mrf.mxu0 }
 0x3a0   :  { %v596_v54 = vrot.slane %v592_v53, 4 }
 0x3a2   :  { %v597_v56 = vadd.f32 %v596_v54, %v592_v53 }
 0x3a4   :  { %v598_v57 = vrot.slane %v597_v56, 2 }
 0x3a6   :  { %v599_v59 = vadd.f32 %v598_v57, %v597_v56 }
 0x3a7   :  { %v594_v60 = vpop.f32.mrf.mxu0 }
 0x3a8   :  { %v600_v61 = vrot.slane %v599_v59, 1 }
 0x3aa   :  { %v601_v63 = vadd.f32 %v600_v61, %v599_v59 }
 0x3ac   :  { %v602_v0 = vmul.f32 %v601_v63, %v2116_v20 }
 0x3ae   :  { %v603_v2 = vsub.f32 %v592_v53, %v602_v0 }
 0x3b0   :  { %v604_v3 = vmul.f32 %v603_v2, %v603_v2 }
 0x3b2   :  { %v605_v5 = vrot.slane %v604_v3, 4 }
 0x3b4   :  { %v606_v6 = vadd.f32 %v605_v5, %v604_v3  ;;  %v1693_v3 = vld [vmem:[#allocation8 + $0x5] ss:$0 sm:$0xff] }
 0x3b6   :  { %v607_v8 = vrot.slane %v606_v6, 2 }
 0x3b8   :  { %v608_v9 = vadd.f32 %v607_v8, %v606_v6  ;;  %v1654_v8 = vld [vmem:[#allocation5 + $0x1f8] sm:$0xff] }
 0x3b9   :  { %925 = vmatpush.bf16.msrb.mxu3 %v1654_v8 }
 0x3ba   :  { %v609_v11 = vrot.slane %v608_v9, 1 }
 0x3bc   :  { %v610_v12 = vadd.f32 %v609_v11, %v608_v9  ;;  %v1653_v11 = vld [vmem:[#allocation5 + $0x1f0] sm:$0xff] }
 0x3bd   :  { %926 = vmatpush.bf16.msrb.mxu3 %v1653_v11 }
 0x3be   :  { %v611_v13 = vmul.f32 %v610_v12, %v2116_v20 }
 0x3c0   :  { %v613_v14 = vadd.f32 1e-05, %v611_v13 }
 0x3c2   :  { %1708 = vrsqrt.f32 %v613_v14  ;;  %vm620_vm15 = vweird.f32 %v613_v14 }
 0x3c8   :  { %v1709_v15 = vpop.eup %1708 }
 0x3c9   :  { %v615_v16 = vmul.f32 %v1709_v15, %v613_v14  ;;  %vm621_vm14 = vweird.f32 %v1709_v15 }
 0x3ca   :  { %vm622_vm0 = vmor %vm620_vm15, %vm621_vm14 }
 0x3cb   :  { %v616_v17 = vmul.f32 %v1709_v15, %v615_v16 }
 0x3cd   :  { %v617_v18 = vmul.f32 0.5, %v616_v17 }
 0x3cf   :  { %v618_v19 = vsub.f32 1.5, %v617_v18  ;;  %v1651_v18 = vld [vmem:[#allocation5 + $0x1e0] sm:$0xff] }
 0x3d1   :  { %v619_v22 = vmul.f32 %v1709_v15, %v618_v19 }
 0x3d3   :  { %v623_v23 = vsel %vm622_vm0, %v1709_v15, %v619_v22  ;;  %v1652_v15 = vld [vmem:[#allocation5 + $0x1e8] sm:$0xff]  ;;  %v1650_v22 = vld [vmem:[#allocation5 + $0x1d8] sm:$0xff] }
 0x3d4   :  { %v624_v24 = vmul.f32 %v623_v23, %v612_v21  ;;  %927 = vmatpush.bf16.msrb.mxu3 %v1652_v15 }
 0x3d6   :  { %v625_v25 = vperm.slane %v624_v24, 0 }
 0x3d8   :  { %v626_v27 = vmul.f32 %v625_v25, %v603_v2  ;;  %928 = vmatpush.bf16.msrb.mxu3 %v1651_v18  ;;  %v1649_v25 = vld [vmem:[#allocation5 + $0x1d0] sm:$0xff]  ;;  %v954_v18 = vld [vmem:[#allocation7 + $0x7] sm:$0x1] }
 0x3da   :  { %v629_v28 = vadd.f32 %v1692_v26, %v626_v27 }
 0x3dc   :  { %v631_v29 = vpack.c.bf16 %v629_v28, %v629_v28  ;;  %630 = vst [vmem:[#allocation17] sm:$0xff] %v629_v28  ;;  %929 = vmatpush.bf16.msrb.mxu3 %v1650_v22  ;;  %v1648_v28 = vld [vmem:[#allocation5 + $0x1c8] sm:$0xff] }
 0x3dd   :  { %1237 = dma.vmem_to_hbm [thread:$0]  %s1233_s6, 128, %s1235_s17, [#allocation18]  }
 0x3de   :  { %705 = vmatmul.bf16.vlgmr.msrb.gmra.mxu1 %v631_v29  ;;  %1248 = dma.vmem_to_hbm [thread:$0]  %s1244_s7, 128, %s1246_s25, [#allocation18]  }
 0x3e0   :  { %930 = vmatpush.bf16.msrb.mxu3 %v1649_v25 }
 0x3e4   :  { %931 = vmatpush.bf16.msrb.mxu3 %v1648_v28 }
 0x3e8   :  { %932 = vmatpush.bf16.msrb.mxu3 %v1647_v30  ;;  %v1670_v30 = vld [vmem:[#allocation5 + $0x278] sm:$0xff] }
 0x3e9   :  { %1158 = vmatpush.bf16.msra.mxu1 %v1670_v30 }
 0x45b   :  { %v706_v31 = vpop.f32.mrf.mxu1 }
 0x45c   :  { %v710_v32 = vrot.slane %v706_v31, 4 }
 0x45e   :  { %v711_v34 = vadd.f32 %v710_v32, %v706_v31 }
 0x460   :  { %v712_v35 = vrot.slane %v711_v34, 2 }
 0x462   :  { %v713_v37 = vadd.f32 %v712_v35, %v711_v34 }
 0x463   :  { %v708_v38 = vpop.f32.mrf.mxu1 }
 0x464   :  { %v714_v39 = vrot.slane %v713_v37, 1 }
 0x466   :  { %v715_v41 = vadd.f32 %v714_v39, %v713_v37 }
 0x468   :  { %v716_v42 = vmul.f32 %v715_v41, %v2116_v20 }
 0x46a   :  { %v717_v44 = vsub.f32 %v706_v31, %v716_v42 }
 0x46c   :  { %v718_v45 = vmul.f32 %v717_v44, %v717_v44 }
 0x46e   :  { %v719_v47 = vrot.slane %v718_v45, 4 }
 0x470   :  { %v720_v48 = vadd.f32 %v719_v47, %v718_v45  ;;  %v1694_v45 = vld [vmem:[#allocation8 + $0x6] ss:$0 sm:$0xff] }
 0x472   :  { %v721_v50 = vrot.slane %v720_v48, 2 }
 0x474   :  { %v722_v51 = vadd.f32 %v721_v50, %v720_v48 }
 0x476   :  { %v723_v53 = vrot.slane %v722_v51, 1 }
 0x478   :  { %v724_v54 = vadd.f32 %v723_v53, %v722_v51  ;;  %v1662_v51 = vld [vmem:[#allocation5 + $0x238] sm:$0xff] }
 0x479   :  { %1039 = vmatpush.bf16.msra.mxu0 %v1662_v51 }
 0x47a   :  { %v725_v55 = vmul.f32 %v724_v54, %v2116_v20  ;;  %v1661_v54 = vld [vmem:[#allocation5 + $0x230] sm:$0xff] }
 0x47c   :  { %v727_v56 = vadd.f32 1e-05, %v725_v55 }
 0x47d   :  { %1040 = vmatpush.bf16.msra.mxu0 %v1661_v54 }
 0x47e   :  { %1710 = vrsqrt.f32 %v727_v56  ;;  %vm734_vm2 = vweird.f32 %v727_v56 }
 0x484   :  { %v1711_v57 = vpop.eup %1710 }
 0x485   :  { %v729_v58 = vmul.f32 %v1711_v57, %v727_v56  ;;  %vm735_vm1 = vweird.f32 %v1711_v57 }
 0x486   :  { %vm736_vm3 = vmor %vm734_vm2, %vm735_vm1 }
 0x487   :  { %v730_v59 = vmul.f32 %v1711_v57, %v729_v58  ;;  %v1660_v58 = vld [vmem:[#allocation5 + $0x228] sm:$0xff] }
 0x488   :  { %1041 = vmatpush.bf16.msra.mxu0 %v1660_v58 }
 0x489   :  { %v731_v60 = vmul.f32 0.5, %v730_v59 }
 0x48b   :  { %v732_v61 = vsub.f32 1.5, %v731_v60 }
 0x48d   :  { %v733_v63 = vmul.f32 %v1711_v57, %v732_v61  ;;  %v1659_v61 = vld [vmem:[#allocation5 + $0x220] sm:$0xff] }
 0x48e   :  { %1042 = vmatpush.bf16.msra.mxu0 %v1659_v61  ;;  %v1068_v61 = vld [vmem:[#allocation7 + $0x8] sm:$0x1] }
 0x48f   :  { %v737_v0 = vsel %vm736_vm3, %v1711_v57, %v733_v63 }
 0x490   :  { %v738_v1 = vmul.f32 %v737_v0, %v726_v62  ;;  %v1658_v0 = vld [vmem:[#allocation5 + $0x218] sm:$0xff] }
 0x492   :  { %v739_v2 = vperm.slane %v738_v1, 0  ;;  %1043 = vmatpush.bf16.msra.mxu0 %v1658_v0 }
 0x494   :  { %v740_v4 = vmul.f32 %v739_v2, %v717_v44 }
 0x496   :  { %v743_v5 = vadd.f32 %v1693_v3, %v740_v4  ;;  %v1657_v3 = vld [vmem:[#allocation5 + $0x210] sm:$0xff] }
 0x497   :  { %1044 = vmatpush.bf16.msra.mxu0 %v1657_v3 }
 0x498   :  { %v745_v6 = vpack.c.bf16 %v743_v5, %v743_v5  ;;  %744 = vst [vmem:[#allocation16] sm:$0xff] %v743_v5 }
 0x499   :  { %1226 = dma.vmem_to_hbm [thread:$0]  %s1222_s22, 128, %s1224_s10, [#allocation15]  }
 0x49a   :  { %819 = vmatmul.bf16.vlgmr.msrb.gmra.mxu2 %v745_v6  ;;  %v1656_v6 = vld [vmem:[#allocation5 + $0x208] sm:$0xff] }
 0x49b   :  { %1045 = vmatpush.bf16.msra.mxu0 %v1656_v6  ;;  %v1697_v6 = vld [vmem:[%s2167_s4] ss:$0 sm:$0xff] }
 0x51d   :  { %v820_v7 = vpop.f32.mrf.mxu2 }
 0x51e   :  { %v824_v9 = vrot.slane %v820_v7, 4 }
 0x520   :  { %v825_v10 = vadd.f32 %v824_v9, %v820_v7  ;;  %v1655_v9 = vld [vmem:[#allocation5 + $0x200] sm:$0xff] }
 0x521   :  { %1046 = vmatpush.bf16.msra.mxu0 %v1655_v9 }
 0x522   :  { %v826_v12 = vrot.slane %v825_v10, 2 }
 0x524   :  { %v827_v13 = vadd.f32 %v826_v12, %v825_v10 }
 0x525   :  { %v822_v14 = vpop.f32.mrf.mxu2 }
 0x526   :  { %v828_v16 = vrot.slane %v827_v13, 1 }
 0x528   :  { %v829_v17 = vadd.f32 %v828_v16, %v827_v13 }
 0x52a   :  { %v830_v19 = vmul.f32 %v829_v17, %v2116_v20 }
 0x52c   :  { %v831_v21 = vsub.f32 %v820_v7, %v830_v19 }
 0x52e   :  { %v832_v23 = vmul.f32 %v831_v21, %v831_v21 }
 0x530   :  { %v833_v24 = vrot.slane %v832_v23, 4 }
 0x532   :  { %v834_v26 = vadd.f32 %v833_v24, %v832_v23  ;;  %v1695_v24 = vld [vmem:[#allocation8 + $0x7] ss:$0 sm:$0xff] }
 0x534   :  { %v835_v27 = vrot.slane %v834_v26, 2 }
 0x536   :  { %v836_v29 = vadd.f32 %v835_v27, %v834_v26 }
 0x538   :  { %v837_v31 = vrot.slane %v836_v29, 1 }
 0x53a   :  { %v838_v32 = vadd.f32 %v837_v31, %v836_v29 }
 0x53c   :  { %v839_v33 = vmul.f32 %v838_v32, %v2116_v20 }
 0x53e   :  { %v841_v34 = vadd.f32 1e-05, %v839_v33  ;;  %v1669_v33 = vld [vmem:[#allocation5 + $0x270] sm:$0xff] }
 0x53f   :  { %1159 = vmatpush.bf16.msra.mxu1 %v1669_v33 }
 0x540   :  { %1712 = vrsqrt.f32 %v841_v34  ;;  %vm848_vm5 = vweird.f32 %v841_v34 }
 0x546   :  { %v1713_v35 = vpop.eup %1712 }
 0x547   :  { %v843_v36 = vmul.f32 %v1713_v35, %v841_v34  ;;  %vm849_vm4 = vweird.f32 %v1713_v35 }
 0x548   :  { %vm850_vm6 = vmor %vm848_vm5, %vm849_vm4 }
 0x549   :  { %v844_v37 = vmul.f32 %v1713_v35, %v843_v36 }
 0x54b   :  { %v845_v38 = vmul.f32 0.5, %v844_v37  ;;  %v1668_v37 = vld [vmem:[#allocation5 + $0x268] sm:$0xff] }
 0x54c   :  { %1160 = vmatpush.bf16.msra.mxu1 %v1668_v37 }
 0x54d   :  { %v846_v39 = vsub.f32 1.5, %v845_v38 }
 0x54f   :  { %v847_v41 = vmul.f32 %v1713_v35, %v846_v39 }
 0x551   :  { %v851_v42 = vsel %vm850_vm6, %v1713_v35, %v847_v41 }
 0x552   :  { %v852_v43 = vmul.f32 %v851_v42, %v840_v40  ;;  %v1667_v40 = vld [vmem:[#allocation5 + $0x260] sm:$0xff] }
 0x553   :  { %1161 = vmatpush.bf16.msra.mxu1 %v1667_v40 }
 0x554   :  { %v853_v44 = vperm.slane %v852_v43, 0  ;;  %v1666_v43 = vld [vmem:[#allocation5 + $0x258] sm:$0xff] }
 0x556   :  { %v854_v46 = vmul.f32 %v853_v44, %v831_v21 }
 0x557   :  { %1162 = vmatpush.bf16.msra.mxu1 %v1666_v43 }
 0x558   :  { %v857_v47 = vadd.f32 %v1694_v45, %v854_v46  ;;  %v1665_v46 = vld [vmem:[#allocation5 + $0x250] sm:$0xff] }
 0x55a   :  { %v858_v48 = vmax.f32 %v857_v47, 0.0 }
 0x55b   :  { %1163 = vmatpush.bf16.msra.mxu1 %v1665_v46 }
 0x55c   :  { %v859_v49 = vpack.c.bf16 %v858_v48, %v858_v48 }
 0x55e   :  { %933 = vmatmul.bf16.vlgmr.msrb.gmra.mxu3 %v859_v49  ;;  %v1664_v49 = vld [vmem:[#allocation5 + $0x248] sm:$0xff] }
 0x55f   :  { %1164 = vmatpush.bf16.msra.mxu1 %v1664_v49 }
 0x5e1   :  { %v934_v50 = vpop.f32.mrf.mxu3 }
 0x5e2   :  { %v938_v52 = vrot.slane %v934_v50, 4 }
 0x5e4   :  { %v939_v53 = vadd.f32 %v938_v52, %v934_v50  ;;  %v1663_v52 = vld [vmem:[#allocation5 + $0x240] sm:$0xff] }
 0x5e5   :  { %1165 = vmatpush.bf16.msra.mxu1 %v1663_v52 }
 0x5e6   :  { %v940_v55 = vrot.slane %v939_v53, 2 }
 0x5e8   :  { %v941_v56 = vadd.f32 %v940_v55, %v939_v53 }
 0x5e9   :  { %v936_v57 = vpop.f32.mrf.mxu3 }
 0x5ea   :  { %v942_v59 = vrot.slane %v941_v56, 1 }
 0x5ec   :  { %v943_v60 = vadd.f32 %v942_v59, %v941_v56 }
 0x5ee   :  { %v944_v62 = vmul.f32 %v943_v60, %v2116_v20 }
 0x5f0   :  { %v945_v63 = vsub.f32 %v934_v50, %v944_v62 }
 0x5f2   :  { %v946_v1 = vmul.f32 %v945_v63, %v945_v63 }
 0x5f4   :  { %v947_v2 = vrot.slane %v946_v1, 4 }
 0x5f6   :  { %v948_v4 = vadd.f32 %v947_v2, %v946_v1  ;;  %v1696_v2 = vld [vmem:[#allocation8 + $0x8] ss:$0 sm:$0xff] }
 0x5f8   :  { %v949_v5 = vrot.slane %v948_v4, 2 }
 0x5fa   :  { %v950_v7 = vadd.f32 %v949_v5, %v948_v4 }
 0x5fc   :  { %v951_v8 = vrot.slane %v950_v7, 1 }
 0x5fe   :  { %v952_v10 = vadd.f32 %v951_v8, %v950_v7 }
 0x600   :  { %v953_v11 = vmul.f32 %v952_v10, %v2116_v20 }
 0x602   :  { %v955_v12 = vadd.f32 1e-05, %v953_v11 }
 0x604   :  { %1714 = vrsqrt.f32 %v955_v12  ;;  %vm962_vm8 = vweird.f32 %v955_v12 }
 0x60a   :  { %v1715_v13 = vpop.eup %1714 }
 0x60b   :  { %v957_v14 = vmul.f32 %v1715_v13, %v955_v12  ;;  %vm963_vm7 = vweird.f32 %v1715_v13 }
 0x60c   :  { %vm964_vm9 = vmor %vm962_vm8, %vm963_vm7 }
 0x60d   :  { %v958_v15 = vmul.f32 %v1715_v13, %v957_v14 }
 0x60f   :  { %v959_v16 = vmul.f32 0.5, %v958_v15 }
 0x611   :  { %v960_v17 = vsub.f32 1.5, %v959_v16 }
 0x613   :  { %v961_v19 = vmul.f32 %v1715_v13, %v960_v17 }
 0x615   :  { %v965_v21 = vsel %vm964_vm9, %v1715_v13, %v961_v19 }
 0x616   :  { %v966_v22 = vmul.f32 %v965_v21, %v954_v18 }
 0x618   :  { %v967_v23 = vperm.slane %v966_v22, 0 }
 0x61a   :  { %v968_v25 = vmul.f32 %v967_v23, %v945_v63 }
 0x61c   :  { %v971_v26 = vadd.f32 %v1695_v24, %v968_v25 }
 0x61e   :  { %v972_v27 = vmax.f32 %v971_v26, 0.0 }
 0x620   :  { %v973_v28 = vpack.c.bf16 %v972_v27, %v972_v27 }
 0x622   :  { %1047 = vmatmul.bf16.vlgmr.msra.gmra.mxu0 %v973_v28 }
 0x69f   :  { %v1048_v29 = vpop.f32.mrf.mxu0 }
 0x6a0   :  { %v1052_v31 = vrot.slane %v1048_v29, 4 }
 0x6a2   :  { %v1053_v32 = vadd.f32 %v1052_v31, %v1048_v29 }
 0x6a4   :  { %v1054_v34 = vrot.slane %v1053_v32, 2 }
 0x6a6   :  { %v1055_v35 = vadd.f32 %v1054_v34, %v1053_v32 }
 0x6a7   :  { %v1050_v36 = vpop.f32.mrf.mxu0 }
 0x6a8   :  { %v1056_v38 = vrot.slane %v1055_v35, 1 }
 0x6aa   :  { %v1057_v39 = vadd.f32 %v1056_v38, %v1055_v35 }
 0x6ac   :  { %v1058_v41 = vmul.f32 %v1057_v39, %v2116_v20 }
 0x6ae   :  { %v1059_v42 = vsub.f32 %v1048_v29, %v1058_v41 }
 0x6b0   :  { %v1060_v44 = vmul.f32 %v1059_v42, %v1059_v42 }
 0x6b2   :  { %v1061_v45 = vrot.slane %v1060_v44, 4 }
 0x6b4   :  { %v1062_v47 = vadd.f32 %v1061_v45, %v1060_v44 }
 0x6b6   :  { %v1063_v48 = vrot.slane %v1062_v47, 2 }
 0x6b8   :  { %v1064_v50 = vadd.f32 %v1063_v48, %v1062_v47 }
 0x6ba   :  { %v1065_v51 = vrot.slane %v1064_v50, 1 }
 0x6bc   :  { %v1066_v53 = vadd.f32 %v1065_v51, %v1064_v50 }
 0x6be   :  { %v1067_v54 = vmul.f32 %v1066_v53, %v2116_v20 }
 0x6c0   :  { %v1069_v55 = vadd.f32 1e-05, %v1067_v54 }
 0x6c2   :  { %1716 = vrsqrt.f32 %v1069_v55  ;;  %vm1076_vm11 = vweird.f32 %v1069_v55 }
 0x6c8   :  { %v1717_v56 = vpop.eup %1716 }
 0x6c9   :  { %v1071_v57 = vmul.f32 %v1717_v56, %v1069_v55  ;;  %vm1077_vm10 = vweird.f32 %v1717_v56 }
 0x6ca   :  { %vm1078_vm12 = vmor %vm1076_vm11, %vm1077_vm10 }
 0x6cb   :  { %v1072_v58 = vmul.f32 %v1717_v56, %v1071_v57 }
 0x6cd   :  { %v1073_v59 = vmul.f32 0.5, %v1072_v58 }
 0x6cf   :  { %v1074_v60 = vsub.f32 1.5, %v1073_v59 }
 0x6d1   :  { %v1075_v62 = vmul.f32 %v1717_v56, %v1074_v60 }
 0x6d3   :  { %v1079_v63 = vsel %vm1078_vm12, %v1717_v56, %v1075_v62 }
 0x6d4   :  { %v1080_v0 = vmul.f32 %v1079_v63, %v1068_v61 }
 0x6d6   :  { %v1081_v1 = vperm.slane %v1080_v0, 0 }
 0x6d8   :  { %v1082_v3 = vmul.f32 %v1081_v1, %v1059_v42 }
 0x6da   :  { %v1085_v4 = vadd.f32 %v1696_v2, %v1082_v3 }
 0x6dc   :  { %v1086_v5 = vmax.f32 %v1085_v4, 0.0 }
 0x6de   :  { %1087 = vst [vmem:[#allocation20] sm:$0xff] %v1086_v5  ;;  %v1088_v20 = vpack.c.bf16 %v1086_v5, %v1086_v5 }
 0x6df   :  { %1259 = dma.vmem_to_hbm [thread:$0]  %s1255_s28, 128, %s1257_s13, [#allocation21]  }
 0x6e0   :  { %1166 = vmatmul.bf16.vlgmr.msra.gmra.mxu1 %v1088_v20 }
 0x75d   :  { %v1167_v7 = vpop.f32.mrf.mxu1 }
 0x75e   :  { %v1168_v8 = vadd.f32 %v1697_v6, %v1167_v7 }
 0x760   :  { %1171 = vst [vmem:[#allocation10] sm:$0xff] %v1168_v8 }
 0x761   :  { %1182 = dma.vmem_to_hbm [thread:$0]  %s1178_s11, 128, %s1180_s1, [#allocation4]  }
 0x765   :  { %v1169_v9 = vpop.f32.mrf.mxu1 }
 0x766   :  { %2012 = dma.done.wait [#allocation4], 128  }
 0x767   :  { %2013 = vsyncadd [#allocation4], 4294967168 }
 0x768   :  { %2014 = dma.done.wait [#allocation12], 256  }
 0x769   :  { %2015 = vsyncadd [#allocation12], 4294967040 }
 0x76a   :  { %2016 = dma.done.wait [#allocation15], 256  }
 0x76b   :  { %2017 = vsyncadd [#allocation15], 4294967040 }
 0x76c   :  { %2018 = dma.done.wait [#allocation18], 256  }
 0x76d   :  { %2019 = vsyncadd [#allocation18], 4294967040 }
 0x76e   :  { %2020 = dma.done.wait [#allocation21], 128  }
 0x76f   :  { %2021 = vsyncadd [#allocation21], 4294967168 }
 0x770   :  { %1292 = vsyncpa [#allocation3], 1 }
 0x771   :  { %1293 = vsyncpa [#allocation6], 1 }
 0x772   :  { %1294 = vsyncpa [#allocation9], 1 }
 0x773   :  { %1295 = vsyncpa [#allocation4], 1 }
 0x774   :  { %1296 = vsyncpa [#allocation12], 1 }
 0x775   :  { %1297 = vsyncpa [#allocation15], 1 }
 0x776   :  { %1298 = vsyncpa [#allocation18], 1 }
 0x777   :  { %1299 = vsyncpa [#allocation21], 1 }

</bundles_post_ra>
